<compile_context>
chip_gen: v7x
topology: tpu7x:2x2x1
jax: 0.10.0
libtpu: 0.0.40
codegen_flags: <defaults>
</compile_context>

<pallas_src>
import functools
import math

import jax
import jax.numpy as jnp
from jax.experimental import pallas as pl
from jax.experimental.pallas import tpu as pltpu  # noqa: F401  (TPU backend)


# ----------------------------------------------------------------------------
# Fused kernel
# ----------------------------------------------------------------------------

def _layer_norm(x, g, b, eps=1e-5):
    mu = jnp.mean(x, axis=-1, keepdims=True)
    var = jnp.mean((x - mu) ** 2, axis=-1, keepdims=True)
    return (x - mu) * jax.lax.rsqrt(var + eps) * g + b


def _fused_forward_kernel(xc_ref, cw_ref, cb_ref,
                          n1g_ref, n1b_ref,
                          wqkv_ref, bqkv_ref, wo_ref, bo_ref,
                          g1_ref, be1_ref, w1_ref, b1_ref,
                          w2_ref, b2_ref, g2_ref, be2_ref,
                          n2g_ref, n2b_ref,
                          dw1_ref, db1_ref, dw2_ref, db2_ref,
                          o_ref, *, batch, seq, nhead, num_layers):
    # xc_ref : (B*S, 3*Cin)  im2col'd input
    # stacked per-layer weights carry a leading layer axis (num_layers, ...)
    d_model = wo_ref.shape[-1]
    dh = d_model // nhead
    scale = 1.0 / math.sqrt(dh)

    # ---- conv1d (k=3, pad=1) as one im2col matmul, + bias + ReLU ----
    h = jnp.dot(xc_ref[...], cw_ref[...],
                preferred_element_type=jnp.float32) + cb_ref[...]
    h = jnp.maximum(h, 0.0)
    # TODO(synk): nn.Dropout after the conv ReLU is identity in eval mode.

    # ---- norm1 ----
    h = _layer_norm(h, n1g_ref[...], n1b_ref[...])

    # ---- transformer encoder layers (post-LN), static loop over layers ----
    for l in range(num_layers):
        # fused Q|K|V projection: (B*S, D) @ (D, 3D)
        qkv = jnp.dot(h, wqkv_ref[l],
                      preferred_element_type=jnp.float32) + bqkv_ref[l]

        attn_rows = []
        for b in range(batch):                 # static: batch known at trace
            r = b * seq
            heads = []
            for hh in range(nhead):            # static head loop (dh = 8)
                c = hh * dh
                qh = qkv[r:r + seq, c:c + dh]
                kh = qkv[r:r + seq, d_model + c:d_model + c + dh]
                vh = qkv[r:r + seq, 2 * d_model + c:2 * d_model + c + dh]
                s = jnp.einsum('qd,kd->qk', qh, kh,
                               preferred_element_type=jnp.float32) * scale
                s = s - jnp.max(s, axis=-1, keepdims=True)
                p = jnp.exp(s)
                p = p * pl.reciprocal(jnp.sum(p, axis=-1, keepdims=True),
                                      approx=True)
                heads.append(jnp.dot(p, vh, preferred_element_type=jnp.float32))
            attn_rows.append(jnp.concatenate(heads, axis=-1))   # (S, D)
        attn = jnp.concatenate(attn_rows, axis=0)               # (B*S, D)

        attn = jnp.dot(attn, wo_ref[l],
                       preferred_element_type=jnp.float32) + bo_ref[l]
        # TODO(synk): attention / residual dropouts are identity in eval mode.

        # residual + LayerNorm 1
        h1 = _layer_norm(h + attn, g1_ref[l], be1_ref[l])

        # feed-forward (Linear -> ReLU -> Linear)
        f = jnp.dot(h1, w1_ref[l], preferred_element_type=jnp.float32) + b1_ref[l]
        f = jnp.maximum(f, 0.0)
        f = jnp.dot(f, w2_ref[l], preferred_element_type=jnp.float32) + b2_ref[l]

        # residual + LayerNorm 2
        h = _layer_norm(h1 + f, g2_ref[l], be2_ref[l])

    # ---- norm2 ----
    h = _layer_norm(h, n2g_ref[...], n2b_ref[...])

    # ---- decoder: Linear(D, D//2) -> ReLU -> Linear(D//2, target) ----
    dec = jnp.dot(h, dw1_ref[...], preferred_element_type=jnp.float32) + db1_ref[...]
    dec = jnp.maximum(dec, 0.0)
    o_ref[...] = jnp.dot(dec, dw2_ref[...],
                         preferred_element_type=jnp.float32) + db2_ref[...]


# ----------------------------------------------------------------------------
# Wrapper: one pallas_call, whole batch as a single block (no grid)
# ----------------------------------------------------------------------------

def fatigue_regression_forward(x, params, nhead, num_layers):
    # x: (B, S, feature_length) float32
    B, S, F = x.shape
    D = params["conv_w"].shape[-1]
    T = params["dec_w2"].shape[-1]

    # im2col for the k=3, pad=1 conv (layout plumbing; tap-major feature order)
    xp = jnp.pad(x, ((0, 0), (1, 1), (0, 0)))
    xc = jnp.concatenate(
        [xp[:, 0:S, :], xp[:, 1:S + 1, :], xp[:, 2:S + 2, :]], axis=-1
    ).reshape(B * S, 3 * F)
    cw = params["conv_w"].reshape(3 * F, D)   # (3, Cin, D) -> (3*Cin, D)

    kernel = functools.partial(_fused_forward_kernel, batch=B, seq=S,
                               nhead=nhead, num_layers=num_layers)
    out = pl.pallas_call(
        kernel,
        out_shape=jax.ShapeDtypeStruct((B * S, T), jnp.float32),
    )(xc, cw, params["conv_b"],
      params["n1_g"], params["n1_b"],
      params["wqkv"], params["bqkv"], params["wo"], params["bo"],
      params["g1"], params["be1"], params["w1"], params["b1"],
      params["w2"], params["b2"], params["g2"], params["be2"],
      params["n2_g"], params["n2_b"],
      params["dec_w1"], params["dec_b1"], params["dec_w2"], params["dec_b2"])
    return out.reshape(B, S, T)


# ----------------------------------------------------------------------------
# Parameter initialization (deterministic, synthetic)
# ----------------------------------------------------------------------------

def init_params(key, d_model, nhead, dim_feedforward, num_layers,
                feature_length, target_length):
    def nrm(k, shape, scale=0.02):
        return (scale * jax.random.normal(k, shape)).astype(jnp.float32)

    keys = iter(jax.random.split(key, 8 + 6 * num_layers))
    p = {}
    # conv1: Conv1d(feature_length, d_model, k=3, pad=1) — tap-major (3, Cin, D)
    p["conv_w"] = nrm(next(keys), (3, feature_length, d_model))
    p["conv_b"] = nrm(next(keys), (1, d_model))
    # norm1 / norm2
    p["n1_g"] = jnp.ones((1, d_model), jnp.float32)
    p["n1_b"] = jnp.zeros((1, d_model), jnp.float32)
    p["n2_g"] = jnp.ones((1, d_model), jnp.float32)
    p["n2_b"] = jnp.zeros((1, d_model), jnp.float32)

    # transformer encoder layers — stacked with leading layer axis
    wqkv, wo, w1, w2 = [], [], [], []
    for _ in range(num_layers):
        wq = nrm(next(keys), (d_model, d_model))
        wk = nrm(next(keys), (d_model, d_model))
        wv = nrm(next(keys), (d_model, d_model))
        wqkv.append(jnp.concatenate([wq, wk, wv], axis=-1))   # fused QKV
        wo.append(nrm(next(keys), (d_model, d_model)))
        w1.append(nrm(next(keys), (d_model, dim_feedforward)))
        w2.append(nrm(next(keys), (dim_feedforward, d_model)))
    L = num_layers
    p["wqkv"] = jnp.stack(wqkv)                                   # (L, D, 3D)
    p["bqkv"] = jnp.zeros((L, 1, 3 * d_model), jnp.float32)
    p["wo"] = jnp.stack(wo)                                       # (L, D, D)
    p["bo"] = jnp.zeros((L, 1, d_model), jnp.float32)
    p["g1"] = jnp.ones((L, 1, d_model), jnp.float32)
    p["be1"] = jnp.zeros((L, 1, d_model), jnp.float32)
    p["w1"] = jnp.stack(w1)                                       # (L, D, FF)
    p["b1"] = jnp.zeros((L, 1, dim_feedforward), jnp.float32)
    p["w2"] = jnp.stack(w2)                                       # (L, FF, D)
    p["b2"] = jnp.zeros((L, 1, d_model), jnp.float32)
    p["g2"] = jnp.ones((L, 1, d_model), jnp.float32)
    p["be2"] = jnp.zeros((L, 1, d_model), jnp.float32)

    # decoder: Linear(d_model, d_model//2) -> ReLU -> Linear(d_model//2, target)
    p["dec_w1"] = nrm(next(keys), (d_model, d_model // 2))
    p["dec_b1"] = jnp.zeros((1, d_model // 2), jnp.float32)
    p["dec_w2"] = nrm(next(keys), (d_model // 2, target_length))
    p["dec_b2"] = jnp.zeros((1, target_length), jnp.float32)
    return p


if __name__ == "__main__":
    # Small, forward-consistent shapes.
    B, S = 2, 8
    d_model, nhead, dim_feedforward, num_layers = 32, 4, 64, 2
    feature_length, target_length = 7, 5

    key = jax.random.PRNGKey(0)
    kx, kp = jax.random.split(key)
    x = jax.random.normal(kx, (B, S, feature_length), dtype=jnp.float32)
    params = init_params(kp, d_model, nhead, dim_feedforward, num_layers,
                         feature_length, target_length)

    fwd = jax.jit(functools.partial(fatigue_regression_forward,
                                    nhead=nhead, num_layers=num_layers))
    out = fwd(x, params)
    out = jax.block_until_ready(out)
    assert out.shape == (B, S, target_length), out.shape
    assert out.dtype == jnp.float32
    print("KERNEL_OK")
</pallas_src>

<mosaic_0001>
module attributes {stable_mosaic.version = 11 : i64} {
  func.func @_fused_forward_kernel(%arg0: memref<16x21xf32, #tpu.memory_space<vmem>>, %arg1: memref<21x32xf32, #tpu.memory_space<vmem>>, %arg2: memref<1x32xf32, #tpu.memory_space<vmem>>, %arg3: memref<1x32xf32, #tpu.memory_space<vmem>>, %arg4: memref<1x32xf32, #tpu.memory_space<vmem>>, %arg5: memref<2x32x96xf32, #tpu.memory_space<vmem>>, %arg6: memref<2x1x96xf32, #tpu.memory_space<vmem>>, %arg7: memref<2x32x32xf32, #tpu.memory_space<vmem>>, %arg8: memref<2x1x32xf32, #tpu.memory_space<vmem>>, %arg9: memref<2x1x32xf32, #tpu.memory_space<vmem>>, %arg10: memref<2x1x32xf32, #tpu.memory_space<vmem>>, %arg11: memref<2x32x64xf32, #tpu.memory_space<vmem>>, %arg12: memref<2x1x64xf32, #tpu.memory_space<vmem>>, %arg13: memref<2x64x32xf32, #tpu.memory_space<vmem>>, %arg14: memref<2x1x32xf32, #tpu.memory_space<vmem>>, %arg15: memref<2x1x32xf32, #tpu.memory_space<vmem>>, %arg16: memref<2x1x32xf32, #tpu.memory_space<vmem>>, %arg17: memref<1x32xf32, #tpu.memory_space<vmem>>, %arg18: memref<1x32xf32, #tpu.memory_space<vmem>>, %arg19: memref<32x16xf32, #tpu.memory_space<vmem>>, %arg20: memref<1x16xf32, #tpu.memory_space<vmem>>, %arg21: memref<16x5xf32, #tpu.memory_space<vmem>>, %arg22: memref<1x5xf32, #tpu.memory_space<vmem>>, %arg23: memref<16x5xf32, #tpu.memory_space<vmem>>) attributes {dimension_semantics = [], scalar_prefetch = 0 : i64, scratch_operands = 0 : i64, tpu.core_type = #tpu.core_type<tc>} {
    %c0 = arith.constant 0 : index
    %c0_0 = arith.constant 0 : index
    %0 = vector.load %arg0[%c0, %c0_0] : memref<16x21xf32, #tpu.memory_space<vmem>>, vector<16x21xf32>
    %c0_1 = arith.constant 0 : index
    %c0_2 = arith.constant 0 : index
    %1 = vector.load %arg1[%c0_1, %c0_2] : memref<21x32xf32, #tpu.memory_space<vmem>>, vector<21x32xf32>
    %cst = arith.constant dense<0.000000e+00> : vector<16x32xf32>
    %2 = tpu.matmul %0, %1, %cst {dimension_numbers = #tpu.dot_dimension_numbers<[1], [0], [0], [1], [0, 0, 1, 1], [], []>} : vector<16x21xf32>, vector<21x32xf32>, vector<16x32xf32> -> vector<16x32xf32>
    %c0_3 = arith.constant 0 : index
    %c0_4 = arith.constant 0 : index
    %3 = vector.load %arg2[%c0_3, %c0_4] : memref<1x32xf32, #tpu.memory_space<vmem>>, vector<1x32xf32>
    %4 = vector.broadcast %3 : vector<1x32xf32> to vector<16x32xf32>
    %5 = arith.addf %2, %4 : vector<16x32xf32>
    %cst_5 = arith.constant 0.000000e+00 : f32
    %6 = vector.broadcast %cst_5 : f32 to vector<16x32xf32>
    %7 = arith.maximumf %5, %6 : vector<16x32xf32>
    %c0_6 = arith.constant 0 : index
    %c0_7 = arith.constant 0 : index
    %8 = vector.load %arg3[%c0_6, %c0_7] : memref<1x32xf32, #tpu.memory_space<vmem>>, vector<1x32xf32>
    %c0_8 = arith.constant 0 : index
    %c0_9 = arith.constant 0 : index
    %9 = vector.load %arg4[%c0_8, %c0_9] : memref<1x32xf32, #tpu.memory_space<vmem>>, vector<1x32xf32>
    %cst_10 = arith.constant dense<0.000000e+00> : vector<16xf32>
    %10 = vector.multi_reduction <add>, %7, %cst_10 [1] : vector<16x32xf32> to vector<16xf32>
    %11 = vector.shape_cast %10 : vector<16xf32> to vector<16x1xf32>
    %cst_11 = arith.constant 3.200000e+01 : f32
    %12 = vector.broadcast %cst_11 : f32 to vector<16x1xf32>
    %13 = arith.divf %11, %12 : vector<16x1xf32>
    %14 = vector.broadcast %13 : vector<16x1xf32> to vector<16x32xf32>
    %15 = arith.subf %7, %14 : vector<16x32xf32>
    %16 = arith.mulf %15, %15 : vector<16x32xf32>
    %cst_12 = arith.constant dense<0.000000e+00> : vector<16xf32>
    %17 = vector.multi_reduction <add>, %16, %cst_12 [1] : vector<16x32xf32> to vector<16xf32>
    %18 = vector.shape_cast %17 : vector<16xf32> to vector<16x1xf32>
    %cst_13 = arith.constant 3.200000e+01 : f32
    %19 = vector.broadcast %cst_13 : f32 to vector<16x1xf32>
    %20 = arith.divf %18, %19 : vector<16x1xf32>
    %21 = vector.broadcast %13 : vector<16x1xf32> to vector<16x32xf32>
    %22 = arith.subf %7, %21 : vector<16x32xf32>
    %cst_14 = arith.constant 9.99999974E-6 : f32
    %23 = vector.broadcast %cst_14 : f32 to vector<16x1xf32>
    %24 = arith.addf %20, %23 : vector<16x1xf32>
    %25 = math.rsqrt %24 : vector<16x1xf32>
    %26 = vector.broadcast %25 : vector<16x1xf32> to vector<16x32xf32>
    %27 = arith.mulf %22, %26 : vector<16x32xf32>
    %28 = vector.broadcast %8 : vector<1x32xf32> to vector<16x32xf32>
    %29 = arith.mulf %27, %28 : vector<16x32xf32>
    %30 = vector.broadcast %9 : vector<1x32xf32> to vector<16x32xf32>
    %31 = arith.addf %29, %30 : vector<16x32xf32>
    %c0_15 = arith.constant 0 : index
    %c0_16 = arith.constant 0 : index
    %c0_17 = arith.constant 0 : index
    %32 = vector.load %arg5[%c0_15, %c0_16, %c0_17] : memref<2x32x96xf32, #tpu.memory_space<vmem>>, vector<1x32x96xf32>
    %33 = vector.shape_cast %32 : vector<1x32x96xf32> to vector<32x96xf32>
    %cst_18 = arith.constant dense<0.000000e+00> : vector<16x96xf32>
    %34 = tpu.matmul %31, %33, %cst_18 {dimension_numbers = #tpu.dot_dimension_numbers<[1], [0], [0], [1], [0, 0, 1, 1], [], []>} : vector<16x32xf32>, vector<32x96xf32>, vector<16x96xf32> -> vector<16x96xf32>
    %c0_19 = arith.constant 0 : index
    %c0_20 = arith.constant 0 : index
    %c0_21 = arith.constant 0 : index
    %35 = vector.load %arg6[%c0_19, %c0_20, %c0_21] : memref<2x1x96xf32, #tpu.memory_space<vmem>>, vector<1x1x96xf32>
    %36 = vector.shape_cast %35 : vector<1x1x96xf32> to vector<1x96xf32>
    %37 = vector.broadcast %36 : vector<1x96xf32> to vector<16x96xf32>
    %38 = arith.addf %34, %37 : vector<16x96xf32>
    %39 = vector.extract_strided_slice %38 {offsets = [0, 0], sizes = [8, 8], strides = [1, 1]} : vector<16x96xf32> to vector<8x8xf32>
    %40 = vector.extract_strided_slice %38 {offsets = [0, 32], sizes = [8, 8], strides = [1, 1]} : vector<16x96xf32> to vector<8x8xf32>
    %41 = vector.extract_strided_slice %38 {offsets = [0, 64], sizes = [8, 8], strides = [1, 1]} : vector<16x96xf32> to vector<8x8xf32>
    "tpu.trace_start"() <{level = 10 : i32, message = "qd,kd->qk"}> : () -> ()
    %cst_22 = arith.constant dense<0.000000e+00> : vector<8x8xf32>
    %42 = tpu.matmul %39, %40, %cst_22 {dimension_numbers = #tpu.dot_dimension_numbers<[1], [1], [0], [0], [0, 0, 1, 0], [], []>} : vector<8x8xf32>, vector<8x8xf32>, vector<8x8xf32> -> vector<8x8xf32>
    "tpu.trace_stop"() : () -> ()
    %cst_23 = arith.constant 0.353553385 : f32
    %43 = vector.broadcast %cst_23 : f32 to vector<8x8xf32>
    %44 = arith.mulf %42, %43 : vector<8x8xf32>
    %cst_24 = arith.constant dense<0xFF800000> : vector<8xf32>
    %45 = vector.multi_reduction <maximumf>, %44, %cst_24 [1] : vector<8x8xf32> to vector<8xf32>
    %46 = vector.shape_cast %45 : vector<8xf32> to vector<8x1xf32>
    %47 = vector.broadcast %46 : vector<8x1xf32> to vector<8x8xf32>
    %48 = arith.subf %44, %47 : vector<8x8xf32>
    %49 = math.exp %48 : vector<8x8xf32>
    %cst_25 = arith.constant dense<0.000000e+00> : vector<8xf32>
    %50 = vector.multi_reduction <add>, %49, %cst_25 [1] : vector<8x8xf32> to vector<8xf32>
    %51 = vector.shape_cast %50 : vector<8xf32> to vector<8x1xf32>
    %52 = tpu.reciprocal %51 {approx = true} : vector<8x1xf32> -> vector<8x1xf32>
    %53 = vector.broadcast %52 : vector<8x1xf32> to vector<8x8xf32>
    %54 = arith.mulf %49, %53 : vector<8x8xf32>
    %cst_26 = arith.constant dense<0.000000e+00> : vector<8x8xf32>
    %55 = tpu.matmul %54, %41, %cst_26 {dimension_numbers = #tpu.dot_dimension_numbers<[1], [0], [0], [1], [0, 0, 1, 1], [], []>} : vector<8x8xf32>, vector<8x8xf32>, vector<8x8xf32> -> vector<8x8xf32>
    %56 = vector.extract_strided_slice %38 {offsets = [0, 8], sizes = [8, 8], strides = [1, 1]} : vector<16x96xf32> to vector<8x8xf32>
    %57 = vector.extract_strided_slice %38 {offsets = [0, 40], sizes = [8, 8], strides = [1, 1]} : vector<16x96xf32> to vector<8x8xf32>
    %58 = vector.extract_strided_slice %38 {offsets = [0, 72], sizes = [8, 8], strides = [1, 1]} : vector<16x96xf32> to vector<8x8xf32>
    "tpu.trace_start"() <{level = 10 : i32, message = "qd,kd->qk"}> : () -> ()
    %cst_27 = arith.constant dense<0.000000e+00> : vector<8x8xf32>
    %59 = tpu.matmul %56, %57, %cst_27 {dimension_numbers = #tpu.dot_dimension_numbers<[1], [1], [0], [0], [0, 0, 1, 0], [], []>} : vector<8x8xf32>, vector<8x8xf32>, vector<8x8xf32> -> vector<8x8xf32>
    "tpu.trace_stop"() : () -> ()
    %cst_28 = arith.constant 0.353553385 : f32
    %60 = vector.broadcast %cst_28 : f32 to vector<8x8xf32>
    %61 = arith.mulf %59, %60 : vector<8x8xf32>
    %cst_29 = arith.constant dense<0xFF800000> : vector<8xf32>
    %62 = vector.multi_reduction <maximumf>, %61, %cst_29 [1] : vector<8x8xf32> to vector<8xf32>
    %63 = vector.shape_cast %62 : vector<8xf32> to vector<8x1xf32>
    %64 = vector.broadcast %63 : vector<8x1xf32> to vector<8x8xf32>
    %65 = arith.subf %61, %64 : vector<8x8xf32>
    %66 = math.exp %65 : vector<8x8xf32>
    %cst_30 = arith.constant dense<0.000000e+00> : vector<8xf32>
    %67 = vector.multi_reduction <add>, %66, %cst_30 [1] : vector<8x8xf32> to vector<8xf32>
    %68 = vector.shape_cast %67 : vector<8xf32> to vector<8x1xf32>
    %69 = tpu.reciprocal %68 {approx = true} : vector<8x1xf32> -> vector<8x1xf32>
    %70 = vector.broadcast %69 : vector<8x1xf32> to vector<8x8xf32>
    %71 = arith.mulf %66, %70 : vector<8x8xf32>
    %cst_31 = arith.constant dense<0.000000e+00> : vector<8x8xf32>
    %72 = tpu.matmul %71, %58, %cst_31 {dimension_numbers = #tpu.dot_dimension_numbers<[1], [0], [0], [1], [0, 0, 1, 1], [], []>} : vector<8x8xf32>, vector<8x8xf32>, vector<8x8xf32> -> vector<8x8xf32>
    %73 = vector.extract_strided_slice %38 {offsets = [0, 16], sizes = [8, 8], strides = [1, 1]} : vector<16x96xf32> to vector<8x8xf32>
    %74 = vector.extract_strided_slice %38 {offsets = [0, 48], sizes = [8, 8], strides = [1, 1]} : vector<16x96xf32> to vector<8x8xf32>
    %75 = vector.extract_strided_slice %38 {offsets = [0, 80], sizes = [8, 8], strides = [1, 1]} : vector<16x96xf32> to vector<8x8xf32>
    "tpu.trace_start"() <{level = 10 : i32, message = "qd,kd->qk"}> : () -> ()
    %cst_32 = arith.constant dense<0.000000e+00> : vector<8x8xf32>
    %76 = tpu.matmul %73, %74, %cst_32 {dimension_numbers = #tpu.dot_dimension_numbers<[1], [1], [0], [0], [0, 0, 1, 0], [], []>} : vector<8x8xf32>, vector<8x8xf32>, vector<8x8xf32> -> vector<8x8xf32>
    "tpu.trace_stop"() : () -> ()
    %cst_33 = arith.constant 0.353553385 : f32
    %77 = vector.broadcast %cst_33 : f32 to vector<8x8xf32>
    %78 = arith.mulf %76, %77 : vector<8x8xf32>
    %cst_34 = arith.constant dense<0xFF800000> : vector<8xf32>
    %79 = vector.multi_reduction <maximumf>, %78, %cst_34 [1] : vector<8x8xf32> to vector<8xf32>
    %80 = vector.shape_cast %79 : vector<8xf32> to vector<8x1xf32>
    %81 = vector.broadcast %80 : vector<8x1xf32> to vector<8x8xf32>
    %82 = arith.subf %78, %81 : vector<8x8xf32>
    %83 = math.exp %82 : vector<8x8xf32>
    %cst_35 = arith.constant dense<0.000000e+00> : vector<8xf32>
    %84 = vector.multi_reduction <add>, %83, %cst_35 [1] : vector<8x8xf32> to vector<8xf32>
    %85 = vector.shape_cast %84 : vector<8xf32> to vector<8x1xf32>
    %86 = tpu.reciprocal %85 {approx = true} : vector<8x1xf32> -> vector<8x1xf32>
    %87 = vector.broadcast %86 : vector<8x1xf32> to vector<8x8xf32>
    %88 = arith.mulf %83, %87 : vector<8x8xf32>
    %cst_36 = arith.constant dense<0.000000e+00> : vector<8x8xf32>
    %89 = tpu.matmul %88, %75, %cst_36 {dimension_numbers = #tpu.dot_dimension_numbers<[1], [0], [0], [1], [0, 0, 1, 1], [], []>} : vector<8x8xf32>, vector<8x8xf32>, vector<8x8xf32> -> vector<8x8xf32>
    %90 = vector.extract_strided_slice %38 {offsets = [0, 24], sizes = [8, 8], strides = [1, 1]} : vector<16x96xf32> to vector<8x8xf32>
    %91 = vector.extract_strided_slice %38 {offsets = [0, 56], sizes = [8, 8], strides = [1, 1]} : vector<16x96xf32> to vector<8x8xf32>
    %92 = vector.extract_strided_slice %38 {offsets = [0, 88], sizes = [8, 8], strides = [1, 1]} : vector<16x96xf32> to vector<8x8xf32>
    "tpu.trace_start"() <{level = 10 : i32, message = "qd,kd->qk"}> : () -> ()
    %cst_37 = arith.constant dense<0.000000e+00> : vector<8x8xf32>
    %93 = tpu.matmul %90, %91, %cst_37 {dimension_numbers = #tpu.dot_dimension_numbers<[1], [1], [0], [0], [0, 0, 1, 0], [], []>} : vector<8x8xf32>, vector<8x8xf32>, vector<8x8xf32> -> vector<8x8xf32>
    "tpu.trace_stop"() : () -> ()
    %cst_38 = arith.constant 0.353553385 : f32
    %94 = vector.broadcast %cst_38 : f32 to vector<8x8xf32>
    %95 = arith.mulf %93, %94 : vector<8x8xf32>
    %cst_39 = arith.constant dense<0xFF800000> : vector<8xf32>
    %96 = vector.multi_reduction <maximumf>, %95, %cst_39 [1] : vector<8x8xf32> to vector<8xf32>
    %97 = vector.shape_cast %96 : vector<8xf32> to vector<8x1xf32>
    %98 = vector.broadcast %97 : vector<8x1xf32> to vector<8x8xf32>
    %99 = arith.subf %95, %98 : vector<8x8xf32>
    %100 = math.exp %99 : vector<8x8xf32>
    %cst_40 = arith.constant dense<0.000000e+00> : vector<8xf32>
    %101 = vector.multi_reduction <add>, %100, %cst_40 [1] : vector<8x8xf32> to vector<8xf32>
    %102 = vector.shape_cast %101 : vector<8xf32> to vector<8x1xf32>
    %103 = tpu.reciprocal %102 {approx = true} : vector<8x1xf32> -> vector<8x1xf32>
    %104 = vector.broadcast %103 : vector<8x1xf32> to vector<8x8xf32>
    %105 = arith.mulf %100, %104 : vector<8x8xf32>
    %cst_41 = arith.constant dense<0.000000e+00> : vector<8x8xf32>
    %106 = tpu.matmul %105, %92, %cst_41 {dimension_numbers = #tpu.dot_dimension_numbers<[1], [0], [0], [1], [0, 0, 1, 1], [], []>} : vector<8x8xf32>, vector<8x8xf32>, vector<8x8xf32> -> vector<8x8xf32>
    %107 = tpu.concatenate %55, %72, %89, %106 in 1 : vector<8x8xf32>, vector<8x8xf32>, vector<8x8xf32>, vector<8x8xf32> -> vector<8x32xf32>
    %108 = vector.extract_strided_slice %38 {offsets = [8, 0], sizes = [8, 8], strides = [1, 1]} : vector<16x96xf32> to vector<8x8xf32>
    %109 = vector.extract_strided_slice %38 {offsets = [8, 32], sizes = [8, 8], strides = [1, 1]} : vector<16x96xf32> to vector<8x8xf32>
    %110 = vector.extract_strided_slice %38 {offsets = [8, 64], sizes = [8, 8], strides = [1, 1]} : vector<16x96xf32> to vector<8x8xf32>
    "tpu.trace_start"() <{level = 10 : i32, message = "qd,kd->qk"}> : () -> ()
    %cst_42 = arith.constant dense<0.000000e+00> : vector<8x8xf32>
    %111 = tpu.matmul %108, %109, %cst_42 {dimension_numbers = #tpu.dot_dimension_numbers<[1], [1], [0], [0], [0, 0, 1, 0], [], []>} : vector<8x8xf32>, vector<8x8xf32>, vector<8x8xf32> -> vector<8x8xf32>
    "tpu.trace_stop"() : () -> ()
    %cst_43 = arith.constant 0.353553385 : f32
    %112 = vector.broadcast %cst_43 : f32 to vector<8x8xf32>
    %113 = arith.mulf %111, %112 : vector<8x8xf32>
    %cst_44 = arith.constant dense<0xFF800000> : vector<8xf32>
    %114 = vector.multi_reduction <maximumf>, %113, %cst_44 [1] : vector<8x8xf32> to vector<8xf32>
    %115 = vector.shape_cast %114 : vector<8xf32> to vector<8x1xf32>
    %116 = vector.broadcast %115 : vector<8x1xf32> to vector<8x8xf32>
    %117 = arith.subf %113, %116 : vector<8x8xf32>
    %118 = math.exp %117 : vector<8x8xf32>
    %cst_45 = arith.constant dense<0.000000e+00> : vector<8xf32>
    %119 = vector.multi_reduction <add>, %118, %cst_45 [1] : vector<8x8xf32> to vector<8xf32>
    %120 = vector.shape_cast %119 : vector<8xf32> to vector<8x1xf32>
    %121 = tpu.reciprocal %120 {approx = true} : vector<8x1xf32> -> vector<8x1xf32>
    %122 = vector.broadcast %121 : vector<8x1xf32> to vector<8x8xf32>
    %123 = arith.mulf %118, %122 : vector<8x8xf32>
    %cst_46 = arith.constant dense<0.000000e+00> : vector<8x8xf32>
    %124 = tpu.matmul %123, %110, %cst_46 {dimension_numbers = #tpu.dot_dimension_numbers<[1], [0], [0], [1], [0, 0, 1, 1], [], []>} : vector<8x8xf32>, vector<8x8xf32>, vector<8x8xf32> -> vector<8x8xf32>
    %125 = vector.extract_strided_slice %38 {offsets = [8, 8], sizes = [8, 8], strides = [1, 1]} : vector<16x96xf32> to vector<8x8xf32>
    %126 = vector.extract_strided_slice %38 {offsets = [8, 40], sizes = [8, 8], strides = [1, 1]} : vector<16x96xf32> to vector<8x8xf32>
    %127 = vector.extract_strided_slice %38 {offsets = [8, 72], sizes = [8, 8], strides = [1, 1]} : vector<16x96xf32> to vector<8x8xf32>
    "tpu.trace_start"() <{level = 10 : i32, message = "qd,kd->qk"}> : () -> ()
    %cst_47 = arith.constant dense<0.000000e+00> : vector<8x8xf32>
    %128 = tpu.matmul %125, %126, %cst_47 {dimension_numbers = #tpu.dot_dimension_numbers<[1], [1], [0], [0], [0, 0, 1, 0], [], []>} : vector<8x8xf32>, vector<8x8xf32>, vector<8x8xf32> -> vector<8x8xf32>
    "tpu.trace_stop"() : () -> ()
    %cst_48 = arith.constant 0.353553385 : f32
    %129 = vector.broadcast %cst_48 : f32 to vector<8x8xf32>
    %130 = arith.mulf %128, %129 : vector<8x8xf32>
    %cst_49 = arith.constant dense<0xFF800000> : vector<8xf32>
    %131 = vector.multi_reduction <maximumf>, %130, %cst_49 [1] : vector<8x8xf32> to vector<8xf32>
    %132 = vector.shape_cast %131 : vector<8xf32> to vector<8x1xf32>
    %133 = vector.broadcast %132 : vector<8x1xf32> to vector<8x8xf32>
    %134 = arith.subf %130, %133 : vector<8x8xf32>
    %135 = math.exp %134 : vector<8x8xf32>
    %cst_50 = arith.constant dense<0.000000e+00> : vector<8xf32>
    %136 = vector.multi_reduction <add>, %135, %cst_50 [1] : vector<8x8xf32> to vector<8xf32>
    %137 = vector.shape_cast %136 : vector<8xf32> to vector<8x1xf32>
    %138 = tpu.reciprocal %137 {approx = true} : vector<8x1xf32> -> vector<8x1xf32>
    %139 = vector.broadcast %138 : vector<8x1xf32> to vector<8x8xf32>
    %140 = arith.mulf %135, %139 : vector<8x8xf32>
    %cst_51 = arith.constant dense<0.000000e+00> : vector<8x8xf32>
    %141 = tpu.matmul %140, %127, %cst_51 {dimension_numbers = #tpu.dot_dimension_numbers<[1], [0], [0], [1], [0, 0, 1, 1], [], []>} : vector<8x8xf32>, vector<8x8xf32>, vector<8x8xf32> -> vector<8x8xf32>
    %142 = vector.extract_strided_slice %38 {offsets = [8, 16], sizes = [8, 8], strides = [1, 1]} : vector<16x96xf32> to vector<8x8xf32>
    %143 = vector.extract_strided_slice %38 {offsets = [8, 48], sizes = [8, 8], strides = [1, 1]} : vector<16x96xf32> to vector<8x8xf32>
    %144 = vector.extract_strided_slice %38 {offsets = [8, 80], sizes = [8, 8], strides = [1, 1]} : vector<16x96xf32> to vector<8x8xf32>
    "tpu.trace_start"() <{level = 10 : i32, message = "qd,kd->qk"}> : () -> ()
    %cst_52 = arith.constant dense<0.000000e+00> : vector<8x8xf32>
    %145 = tpu.matmul %142, %143, %cst_52 {dimension_numbers = #tpu.dot_dimension_numbers<[1], [1], [0], [0], [0, 0, 1, 0], [], []>} : vector<8x8xf32>, vector<8x8xf32>, vector<8x8xf32> -> vector<8x8xf32>
    "tpu.trace_stop"() : () -> ()
    %cst_53 = arith.constant 0.353553385 : f32
    %146 = vector.broadcast %cst_53 : f32 to vector<8x8xf32>
    %147 = arith.mulf %145, %146 : vector<8x8xf32>
    %cst_54 = arith.constant dense<0xFF800000> : vector<8xf32>
    %148 = vector.multi_reduction <maximumf>, %147, %cst_54 [1] : vector<8x8xf32> to vector<8xf32>
    %149 = vector.shape_cast %148 : vector<8xf32> to vector<8x1xf32>
    %150 = vector.broadcast %149 : vector<8x1xf32> to vector<8x8xf32>
    %151 = arith.subf %147, %150 : vector<8x8xf32>
    %152 = math.exp %151 : vector<8x8xf32>
    %cst_55 = arith.constant dense<0.000000e+00> : vector<8xf32>
    %153 = vector.multi_reduction <add>, %152, %cst_55 [1] : vector<8x8xf32> to vector<8xf32>
    %154 = vector.shape_cast %153 : vector<8xf32> to vector<8x1xf32>
    %155 = tpu.reciprocal %154 {approx = true} : vector<8x1xf32> -> vector<8x1xf32>
    %156 = vector.broadcast %155 : vector<8x1xf32> to vector<8x8xf32>
    %157 = arith.mulf %152, %156 : vector<8x8xf32>
    %cst_56 = arith.constant dense<0.000000e+00> : vector<8x8xf32>
    %158 = tpu.matmul %157, %144, %cst_56 {dimension_numbers = #tpu.dot_dimension_numbers<[1], [0], [0], [1], [0, 0, 1, 1], [], []>} : vector<8x8xf32>, vector<8x8xf32>, vector<8x8xf32> -> vector<8x8xf32>
    %159 = vector.extract_strided_slice %38 {offsets = [8, 24], sizes = [8, 8], strides = [1, 1]} : vector<16x96xf32> to vector<8x8xf32>
    %160 = vector.extract_strided_slice %38 {offsets = [8, 56], sizes = [8, 8], strides = [1, 1]} : vector<16x96xf32> to vector<8x8xf32>
    %161 = vector.extract_strided_slice %38 {offsets = [8, 88], sizes = [8, 8], strides = [1, 1]} : vector<16x96xf32> to vector<8x8xf32>
    "tpu.trace_start"() <{level = 10 : i32, message = "qd,kd->qk"}> : () -> ()
    %cst_57 = arith.constant dense<0.000000e+00> : vector<8x8xf32>
    %162 = tpu.matmul %159, %160, %cst_57 {dimension_numbers = #tpu.dot_dimension_numbers<[1], [1], [0], [0], [0, 0, 1, 0], [], []>} : vector<8x8xf32>, vector<8x8xf32>, vector<8x8xf32> -> vector<8x8xf32>
    "tpu.trace_stop"() : () -> ()
    %cst_58 = arith.constant 0.353553385 : f32
    %163 = vector.broadcast %cst_58 : f32 to vector<8x8xf32>
    %164 = arith.mulf %162, %163 : vector<8x8xf32>
    %cst_59 = arith.constant dense<0xFF800000> : vector<8xf32>
    %165 = vector.multi_reduction <maximumf>, %164, %cst_59 [1] : vector<8x8xf32> to vector<8xf32>
    %166 = vector.shape_cast %165 : vector<8xf32> to vector<8x1xf32>
    %167 = vector.broadcast %166 : vector<8x1xf32> to vector<8x8xf32>
    %168 = arith.subf %164, %167 : vector<8x8xf32>
    %169 = math.exp %168 : vector<8x8xf32>
    %cst_60 = arith.constant dense<0.000000e+00> : vector<8xf32>
    %170 = vector.multi_reduction <add>, %169, %cst_60 [1] : vector<8x8xf32> to vector<8xf32>
    %171 = vector.shape_cast %170 : vector<8xf32> to vector<8x1xf32>
    %172 = tpu.reciprocal %171 {approx = true} : vector<8x1xf32> -> vector<8x1xf32>
    %173 = vector.broadcast %172 : vector<8x1xf32> to vector<8x8xf32>
    %174 = arith.mulf %169, %173 : vector<8x8xf32>
    %cst_61 = arith.constant dense<0.000000e+00> : vector<8x8xf32>
    %175 = tpu.matmul %174, %161, %cst_61 {dimension_numbers = #tpu.dot_dimension_numbers<[1], [0], [0], [1], [0, 0, 1, 1], [], []>} : vector<8x8xf32>, vector<8x8xf32>, vector<8x8xf32> -> vector<8x8xf32>
    %176 = tpu.concatenate %124, %141, %158, %175 in 1 : vector<8x8xf32>, vector<8x8xf32>, vector<8x8xf32>, vector<8x8xf32> -> vector<8x32xf32>
    %177 = tpu.concatenate %107, %176 in 0 : vector<8x32xf32>, vector<8x32xf32> -> vector<16x32xf32>
    %c0_62 = arith.constant 0 : index
    %c0_63 = arith.constant 0 : index
    %c0_64 = arith.constant 0 : index
    %178 = vector.load %arg7[%c0_62, %c0_63, %c0_64] : memref<2x32x32xf32, #tpu.memory_space<vmem>>, vector<1x32x32xf32>
    %179 = vector.shape_cast %178 : vector<1x32x32xf32> to vector<32x32xf32>
    %cst_65 = arith.constant dense<0.000000e+00> : vector<16x32xf32>
    %180 = tpu.matmul %177, %179, %cst_65 {dimension_numbers = #tpu.dot_dimension_numbers<[1], [0], [0], [1], [0, 0, 1, 1], [], []>} : vector<16x32xf32>, vector<32x32xf32>, vector<16x32xf32> -> vector<16x32xf32>
    %c0_66 = arith.constant 0 : index
    %c0_67 = arith.constant 0 : index
    %c0_68 = arith.constant 0 : index
    %181 = vector.load %arg8[%c0_66, %c0_67, %c0_68] : memref<2x1x32xf32, #tpu.memory_space<vmem>>, vector<1x1x32xf32>
    %182 = vector.shape_cast %181 : vector<1x1x32xf32> to vector<1x32xf32>
    %183 = vector.broadcast %182 : vector<1x32xf32> to vector<16x32xf32>
    %184 = arith.addf %180, %183 : vector<16x32xf32>
    %185 = arith.addf %31, %184 : vector<16x32xf32>
    %c0_69 = arith.constant 0 : index
    %c0_70 = arith.constant 0 : index
    %c0_71 = arith.constant 0 : index
    %186 = vector.load %arg9[%c0_69, %c0_70, %c0_71] : memref<2x1x32xf32, #tpu.memory_space<vmem>>, vector<1x1x32xf32>
    %187 = vector.shape_cast %186 : vector<1x1x32xf32> to vector<1x32xf32>
    %c0_72 = arith.constant 0 : index
    %c0_73 = arith.constant 0 : index
    %c0_74 = arith.constant 0 : index
    %188 = vector.load %arg10[%c0_72, %c0_73, %c0_74] : memref<2x1x32xf32, #tpu.memory_space<vmem>>, vector<1x1x32xf32>
    %189 = vector.shape_cast %188 : vector<1x1x32xf32> to vector<1x32xf32>
    %cst_75 = arith.constant dense<0.000000e+00> : vector<16xf32>
    %190 = vector.multi_reduction <add>, %185, %cst_75 [1] : vector<16x32xf32> to vector<16xf32>
    %191 = vector.shape_cast %190 : vector<16xf32> to vector<16x1xf32>
    %cst_76 = arith.constant 3.200000e+01 : f32
    %192 = vector.broadcast %cst_76 : f32 to vector<16x1xf32>
    %193 = arith.divf %191, %192 : vector<16x1xf32>
    %194 = vector.broadcast %193 : vector<16x1xf32> to vector<16x32xf32>
    %195 = arith.subf %185, %194 : vector<16x32xf32>
    %196 = arith.mulf %195, %195 : vector<16x32xf32>
    %cst_77 = arith.constant dense<0.000000e+00> : vector<16xf32>
    %197 = vector.multi_reduction <add>, %196, %cst_77 [1] : vector<16x32xf32> to vector<16xf32>
    %198 = vector.shape_cast %197 : vector<16xf32> to vector<16x1xf32>
    %cst_78 = arith.constant 3.200000e+01 : f32
    %199 = vector.broadcast %cst_78 : f32 to vector<16x1xf32>
    %200 = arith.divf %198, %199 : vector<16x1xf32>
    %201 = vector.broadcast %193 : vector<16x1xf32> to vector<16x32xf32>
    %202 = arith.subf %185, %201 : vector<16x32xf32>
    %cst_79 = arith.constant 9.99999974E-6 : f32
    %203 = vector.broadcast %cst_79 : f32 to vector<16x1xf32>
    %204 = arith.addf %200, %203 : vector<16x1xf32>
    %205 = math.rsqrt %204 : vector<16x1xf32>
    %206 = vector.broadcast %205 : vector<16x1xf32> to vector<16x32xf32>
    %207 = arith.mulf %202, %206 : vector<16x32xf32>
    %208 = vector.broadcast %187 : vector<1x32xf32> to vector<16x32xf32>
    %209 = arith.mulf %207, %208 : vector<16x32xf32>
    %210 = vector.broadcast %189 : vector<1x32xf32> to vector<16x32xf32>
    %211 = arith.addf %209, %210 : vector<16x32xf32>
    %c0_80 = arith.constant 0 : index
    %c0_81 = arith.constant 0 : index
    %c0_82 = arith.constant 0 : index
    %212 = vector.load %arg11[%c0_80, %c0_81, %c0_82] : memref<2x32x64xf32, #tpu.memory_space<vmem>>, vector<1x32x64xf32>
    %213 = vector.shape_cast %212 : vector<1x32x64xf32> to vector<32x64xf32>
    %cst_83 = arith.constant dense<0.000000e+00> : vector<16x64xf32>
    %214 = tpu.matmul %211, %213, %cst_83 {dimension_numbers = #tpu.dot_dimension_numbers<[1], [0], [0], [1], [0, 0, 1, 1], [], []>} : vector<16x32xf32>, vector<32x64xf32>, vector<16x64xf32> -> vector<16x64xf32>
    %c0_84 = arith.constant 0 : index
    %c0_85 = arith.constant 0 : index
    %c0_86 = arith.constant 0 : index
    %215 = vector.load %arg12[%c0_84, %c0_85, %c0_86] : memref<2x1x64xf32, #tpu.memory_space<vmem>>, vector<1x1x64xf32>
    %216 = vector.shape_cast %215 : vector<1x1x64xf32> to vector<1x64xf32>
    %217 = vector.broadcast %216 : vector<1x64xf32> to vector<16x64xf32>
    %218 = arith.addf %214, %217 : vector<16x64xf32>
    %cst_87 = arith.constant 0.000000e+00 : f32
    %219 = vector.broadcast %cst_87 : f32 to vector<16x64xf32>
    %220 = arith.maximumf %218, %219 : vector<16x64xf32>
    %c0_88 = arith.constant 0 : index
    %c0_89 = arith.constant 0 : index
    %c0_90 = arith.constant 0 : index
    %221 = vector.load %arg13[%c0_88, %c0_89, %c0_90] : memref<2x64x32xf32, #tpu.memory_space<vmem>>, vector<1x64x32xf32>
    %222 = vector.shape_cast %221 : vector<1x64x32xf32> to vector<64x32xf32>
    %cst_91 = arith.constant dense<0.000000e+00> : vector<16x32xf32>
    %223 = tpu.matmul %220, %222, %cst_91 {dimension_numbers = #tpu.dot_dimension_numbers<[1], [0], [0], [1], [0, 0, 1, 1], [], []>} : vector<16x64xf32>, vector<64x32xf32>, vector<16x32xf32> -> vector<16x32xf32>
    %c0_92 = arith.constant 0 : index
    %c0_93 = arith.constant 0 : index
    %c0_94 = arith.constant 0 : index
    %224 = vector.load %arg14[%c0_92, %c0_93, %c0_94] : memref<2x1x32xf32, #tpu.memory_space<vmem>>, vector<1x1x32xf32>
    %225 = vector.shape_cast %224 : vector<1x1x32xf32> to vector<1x32xf32>
    %226 = vector.broadcast %225 : vector<1x32xf32> to vector<16x32xf32>
    %227 = arith.addf %223, %226 : vector<16x32xf32>
    %228 = arith.addf %211, %227 : vector<16x32xf32>
    %c0_95 = arith.constant 0 : index
    %c0_96 = arith.constant 0 : index
    %c0_97 = arith.constant 0 : index
    %229 = vector.load %arg15[%c0_95, %c0_96, %c0_97] : memref<2x1x32xf32, #tpu.memory_space<vmem>>, vector<1x1x32xf32>
    %230 = vector.shape_cast %229 : vector<1x1x32xf32> to vector<1x32xf32>
    %c0_98 = arith.constant 0 : index
    %c0_99 = arith.constant 0 : index
    %c0_100 = arith.constant 0 : index
    %231 = vector.load %arg16[%c0_98, %c0_99, %c0_100] : memref<2x1x32xf32, #tpu.memory_space<vmem>>, vector<1x1x32xf32>
    %232 = vector.shape_cast %231 : vector<1x1x32xf32> to vector<1x32xf32>
    %cst_101 = arith.constant dense<0.000000e+00> : vector<16xf32>
    %233 = vector.multi_reduction <add>, %228, %cst_101 [1] : vector<16x32xf32> to vector<16xf32>
    %234 = vector.shape_cast %233 : vector<16xf32> to vector<16x1xf32>
    %cst_102 = arith.constant 3.200000e+01 : f32
    %235 = vector.broadcast %cst_102 : f32 to vector<16x1xf32>
    %236 = arith.divf %234, %235 : vector<16x1xf32>
    %237 = vector.broadcast %236 : vector<16x1xf32> to vector<16x32xf32>
    %238 = arith.subf %228, %237 : vector<16x32xf32>
    %239 = arith.mulf %238, %238 : vector<16x32xf32>
    %cst_103 = arith.constant dense<0.000000e+00> : vector<16xf32>
    %240 = vector.multi_reduction <add>, %239, %cst_103 [1] : vector<16x32xf32> to vector<16xf32>
    %241 = vector.shape_cast %240 : vector<16xf32> to vector<16x1xf32>
    %cst_104 = arith.constant 3.200000e+01 : f32
    %242 = vector.broadcast %cst_104 : f32 to vector<16x1xf32>
    %243 = arith.divf %241, %242 : vector<16x1xf32>
    %244 = vector.broadcast %236 : vector<16x1xf32> to vector<16x32xf32>
    %245 = arith.subf %228, %244 : vector<16x32xf32>
    %cst_105 = arith.constant 9.99999974E-6 : f32
    %246 = vector.broadcast %cst_105 : f32 to vector<16x1xf32>
    %247 = arith.addf %243, %246 : vector<16x1xf32>
    %248 = math.rsqrt %247 : vector<16x1xf32>
    %249 = vector.broadcast %248 : vector<16x1xf32> to vector<16x32xf32>
    %250 = arith.mulf %245, %249 : vector<16x32xf32>
    %251 = vector.broadcast %230 : vector<1x32xf32> to vector<16x32xf32>
    %252 = arith.mulf %250, %251 : vector<16x32xf32>
    %253 = vector.broadcast %232 : vector<1x32xf32> to vector<16x32xf32>
    %254 = arith.addf %252, %253 : vector<16x32xf32>
    %c1 = arith.constant 1 : index
    %c0_106 = arith.constant 0 : index
    %c0_107 = arith.constant 0 : index
    %255 = vector.load %arg5[%c1, %c0_106, %c0_107] : memref<2x32x96xf32, #tpu.memory_space<vmem>>, vector<1x32x96xf32>
    %256 = vector.shape_cast %255 : vector<1x32x96xf32> to vector<32x96xf32>
    %cst_108 = arith.constant dense<0.000000e+00> : vector<16x96xf32>
    %257 = tpu.matmul %254, %256, %cst_108 {dimension_numbers = #tpu.dot_dimension_numbers<[1], [0], [0], [1], [0, 0, 1, 1], [], []>} : vector<16x32xf32>, vector<32x96xf32>, vector<16x96xf32> -> vector<16x96xf32>
    %c1_109 = arith.constant 1 : index
    %c0_110 = arith.constant 0 : index
    %c0_111 = arith.constant 0 : index
    %258 = vector.load %arg6[%c1_109, %c0_110, %c0_111] : memref<2x1x96xf32, #tpu.memory_space<vmem>>, vector<1x1x96xf32>
    %259 = vector.shape_cast %258 : vector<1x1x96xf32> to vector<1x96xf32>
    %260 = vector.broadcast %259 : vector<1x96xf32> to vector<16x96xf32>
    %261 = arith.addf %257, %260 : vector<16x96xf32>
    %262 = vector.extract_strided_slice %261 {offsets = [0, 0], sizes = [8, 8], strides = [1, 1]} : vector<16x96xf32> to vector<8x8xf32>
    %263 = vector.extract_strided_slice %261 {offsets = [0, 32], sizes = [8, 8], strides = [1, 1]} : vector<16x96xf32> to vector<8x8xf32>
    %264 = vector.extract_strided_slice %261 {offsets = [0, 64], sizes = [8, 8], strides = [1, 1]} : vector<16x96xf32> to vector<8x8xf32>
    "tpu.trace_start"() <{level = 10 : i32, message = "qd,kd->qk"}> : () -> ()
    %cst_112 = arith.constant dense<0.000000e+00> : vector<8x8xf32>
    %265 = tpu.matmul %262, %263, %cst_112 {dimension_numbers = #tpu.dot_dimension_numbers<[1], [1], [0], [0], [0, 0, 1, 0], [], []>} : vector<8x8xf32>, vector<8x8xf32>, vector<8x8xf32> -> vector<8x8xf32>
    "tpu.trace_stop"() : () -> ()
    %cst_113 = arith.constant 0.353553385 : f32
    %266 = vector.broadcast %cst_113 : f32 to vector<8x8xf32>
    %267 = arith.mulf %265, %266 : vector<8x8xf32>
    %cst_114 = arith.constant dense<0xFF800000> : vector<8xf32>
    %268 = vector.multi_reduction <maximumf>, %267, %cst_114 [1] : vector<8x8xf32> to vector<8xf32>
    %269 = vector.shape_cast %268 : vector<8xf32> to vector<8x1xf32>
    %270 = vector.broadcast %269 : vector<8x1xf32> to vector<8x8xf32>
    %271 = arith.subf %267, %270 : vector<8x8xf32>
    %272 = math.exp %271 : vector<8x8xf32>
    %cst_115 = arith.constant dense<0.000000e+00> : vector<8xf32>
    %273 = vector.multi_reduction <add>, %272, %cst_115 [1] : vector<8x8xf32> to vector<8xf32>
    %274 = vector.shape_cast %273 : vector<8xf32> to vector<8x1xf32>
    %275 = tpu.reciprocal %274 {approx = true} : vector<8x1xf32> -> vector<8x1xf32>
    %276 = vector.broadcast %275 : vector<8x1xf32> to vector<8x8xf32>
    %277 = arith.mulf %272, %276 : vector<8x8xf32>
    %cst_116 = arith.constant dense<0.000000e+00> : vector<8x8xf32>
    %278 = tpu.matmul %277, %264, %cst_116 {dimension_numbers = #tpu.dot_dimension_numbers<[1], [0], [0], [1], [0, 0, 1, 1], [], []>} : vector<8x8xf32>, vector<8x8xf32>, vector<8x8xf32> -> vector<8x8xf32>
    %279 = vector.extract_strided_slice %261 {offsets = [0, 8], sizes = [8, 8], strides = [1, 1]} : vector<16x96xf32> to vector<8x8xf32>
    %280 = vector.extract_strided_slice %261 {offsets = [0, 40], sizes = [8, 8], strides = [1, 1]} : vector<16x96xf32> to vector<8x8xf32>
    %281 = vector.extract_strided_slice %261 {offsets = [0, 72], sizes = [8, 8], strides = [1, 1]} : vector<16x96xf32> to vector<8x8xf32>
    "tpu.trace_start"() <{level = 10 : i32, message = "qd,kd->qk"}> : () -> ()
    %cst_117 = arith.constant dense<0.000000e+00> : vector<8x8xf32>
    %282 = tpu.matmul %279, %280, %cst_117 {dimension_numbers = #tpu.dot_dimension_numbers<[1], [1], [0], [0], [0, 0, 1, 0], [], []>} : vector<8x8xf32>, vector<8x8xf32>, vector<8x8xf32> -> vector<8x8xf32>
    "tpu.trace_stop"() : () -> ()
    %cst_118 = arith.constant 0.353553385 : f32
    %283 = vector.broadcast %cst_118 : f32 to vector<8x8xf32>
    %284 = arith.mulf %282, %283 : vector<8x8xf32>
    %cst_119 = arith.constant dense<0xFF800000> : vector<8xf32>
    %285 = vector.multi_reduction <maximumf>, %284, %cst_119 [1] : vector<8x8xf32> to vector<8xf32>
    %286 = vector.shape_cast %285 : vector<8xf32> to vector<8x1xf32>
    %287 = vector.broadcast %286 : vector<8x1xf32> to vector<8x8xf32>
    %288 = arith.subf %284, %287 : vector<8x8xf32>
    %289 = math.exp %288 : vector<8x8xf32>
    %cst_120 = arith.constant dense<0.000000e+00> : vector<8xf32>
    %290 = vector.multi_reduction <add>, %289, %cst_120 [1] : vector<8x8xf32> to vector<8xf32>
    %291 = vector.shape_cast %290 : vector<8xf32> to vector<8x1xf32>
    %292 = tpu.reciprocal %291 {approx = true} : vector<8x1xf32> -> vector<8x1xf32>
    %293 = vector.broadcast %292 : vector<8x1xf32> to vector<8x8xf32>
    %294 = arith.mulf %289, %293 : vector<8x8xf32>
    %cst_121 = arith.constant dense<0.000000e+00> : vector<8x8xf32>
    %295 = tpu.matmul %294, %281, %cst_121 {dimension_numbers = #tpu.dot_dimension_numbers<[1], [0], [0], [1], [0, 0, 1, 1], [], []>} : vector<8x8xf32>, vector<8x8xf32>, vector<8x8xf32> -> vector<8x8xf32>
    %296 = vector.extract_strided_slice %261 {offsets = [0, 16], sizes = [8, 8], strides = [1, 1]} : vector<16x96xf32> to vector<8x8xf32>
    %297 = vector.extract_strided_slice %261 {offsets = [0, 48], sizes = [8, 8], strides = [1, 1]} : vector<16x96xf32> to vector<8x8xf32>
    %298 = vector.extract_strided_slice %261 {offsets = [0, 80], sizes = [8, 8], strides = [1, 1]} : vector<16x96xf32> to vector<8x8xf32>
    "tpu.trace_start"() <{level = 10 : i32, message = "qd,kd->qk"}> : () -> ()
    %cst_122 = arith.constant dense<0.000000e+00> : vector<8x8xf32>
    %299 = tpu.matmul %296, %297, %cst_122 {dimension_numbers = #tpu.dot_dimension_numbers<[1], [1], [0], [0], [0, 0, 1, 0], [], []>} : vector<8x8xf32>, vector<8x8xf32>, vector<8x8xf32> -> vector<8x8xf32>
    "tpu.trace_stop"() : () -> ()
    %cst_123 = arith.constant 0.353553385 : f32
    %300 = vector.broadcast %cst_123 : f32 to vector<8x8xf32>
    %301 = arith.mulf %299, %300 : vector<8x8xf32>
    %cst_124 = arith.constant dense<0xFF800000> : vector<8xf32>
    %302 = vector.multi_reduction <maximumf>, %301, %cst_124 [1] : vector<8x8xf32> to vector<8xf32>
    %303 = vector.shape_cast %302 : vector<8xf32> to vector<8x1xf32>
    %304 = vector.broadcast %303 : vector<8x1xf32> to vector<8x8xf32>
    %305 = arith.subf %301, %304 : vector<8x8xf32>
    %306 = math.exp %305 : vector<8x8xf32>
    %cst_125 = arith.constant dense<0.000000e+00> : vector<8xf32>
    %307 = vector.multi_reduction <add>, %306, %cst_125 [1] : vector<8x8xf32> to vector<8xf32>
    %308 = vector.shape_cast %307 : vector<8xf32> to vector<8x1xf32>
    %309 = tpu.reciprocal %308 {approx = true} : vector<8x1xf32> -> vector<8x1xf32>
    %310 = vector.broadcast %309 : vector<8x1xf32> to vector<8x8xf32>
    %311 = arith.mulf %306, %310 : vector<8x8xf32>
    %cst_126 = arith.constant dense<0.000000e+00> : vector<8x8xf32>
    %312 = tpu.matmul %311, %298, %cst_126 {dimension_numbers = #tpu.dot_dimension_numbers<[1], [0], [0], [1], [0, 0, 1, 1], [], []>} : vector<8x8xf32>, vector<8x8xf32>, vector<8x8xf32> -> vector<8x8xf32>
    %313 = vector.extract_strided_slice %261 {offsets = [0, 24], sizes = [8, 8], strides = [1, 1]} : vector<16x96xf32> to vector<8x8xf32>
    %314 = vector.extract_strided_slice %261 {offsets = [0, 56], sizes = [8, 8], strides = [1, 1]} : vector<16x96xf32> to vector<8x8xf32>
    %315 = vector.extract_strided_slice %261 {offsets = [0, 88], sizes = [8, 8], strides = [1, 1]} : vector<16x96xf32> to vector<8x8xf32>
    "tpu.trace_start"() <{level = 10 : i32, message = "qd,kd->qk"}> : () -> ()
    %cst_127 = arith.constant dense<0.000000e+00> : vector<8x8xf32>
    %316 = tpu.matmul %313, %314, %cst_127 {dimension_numbers = #tpu.dot_dimension_numbers<[1], [1], [0], [0], [0, 0, 1, 0], [], []>} : vector<8x8xf32>, vector<8x8xf32>, vector<8x8xf32> -> vector<8x8xf32>
    "tpu.trace_stop"() : () -> ()
    %cst_128 = arith.constant 0.353553385 : f32
    %317 = vector.broadcast %cst_128 : f32 to vector<8x8xf32>
    %318 = arith.mulf %316, %317 : vector<8x8xf32>
    %cst_129 = arith.constant dense<0xFF800000> : vector<8xf32>
    %319 = vector.multi_reduction <maximumf>, %318, %cst_129 [1] : vector<8x8xf32> to vector<8xf32>
    %320 = vector.shape_cast %319 : vector<8xf32> to vector<8x1xf32>
    %321 = vector.broadcast %320 : vector<8x1xf32> to vector<8x8xf32>
    %322 = arith.subf %318, %321 : vector<8x8xf32>
    %323 = math.exp %322 : vector<8x8xf32>
    %cst_130 = arith.constant dense<0.000000e+00> : vector<8xf32>
    %324 = vector.multi_reduction <add>, %323, %cst_130 [1] : vector<8x8xf32> to vector<8xf32>
    %325 = vector.shape_cast %324 : vector<8xf32> to vector<8x1xf32>
    %326 = tpu.reciprocal %325 {approx = true} : vector<8x1xf32> -> vector<8x1xf32>
    %327 = vector.broadcast %326 : vector<8x1xf32> to vector<8x8xf32>
    %328 = arith.mulf %323, %327 : vector<8x8xf32>
    %cst_131 = arith.constant dense<0.000000e+00> : vector<8x8xf32>
    %329 = tpu.matmul %328, %315, %cst_131 {dimension_numbers = #tpu.dot_dimension_numbers<[1], [0], [0], [1], [0, 0, 1, 1], [], []>} : vector<8x8xf32>, vector<8x8xf32>, vector<8x8xf32> -> vector<8x8xf32>
    %330 = tpu.concatenate %278, %295, %312, %329 in 1 : vector<8x8xf32>, vector<8x8xf32>, vector<8x8xf32>, vector<8x8xf32> -> vector<8x32xf32>
    %331 = vector.extract_strided_slice %261 {offsets = [8, 0], sizes = [8, 8], strides = [1, 1]} : vector<16x96xf32> to vector<8x8xf32>
    %332 = vector.extract_strided_slice %261 {offsets = [8, 32], sizes = [8, 8], strides = [1, 1]} : vector<16x96xf32> to vector<8x8xf32>
    %333 = vector.extract_strided_slice %261 {offsets = [8, 64], sizes = [8, 8], strides = [1, 1]} : vector<16x96xf32> to vector<8x8xf32>
    "tpu.trace_start"() <{level = 10 : i32, message = "qd,kd->qk"}> : () -> ()
    %cst_132 = arith.constant dense<0.000000e+00> : vector<8x8xf32>
    %334 = tpu.matmul %331, %332, %cst_132 {dimension_numbers = #tpu.dot_dimension_numbers<[1], [1], [0], [0], [0, 0, 1, 0], [], []>} : vector<8x8xf32>, vector<8x8xf32>, vector<8x8xf32> -> vector<8x8xf32>
    "tpu.trace_stop"() : () -> ()
    %cst_133 = arith.constant 0.353553385 : f32
    %335 = vector.broadcast %cst_133 : f32 to vector<8x8xf32>
    %336 = arith.mulf %334, %335 : vector<8x8xf32>
    %cst_134 = arith.constant dense<0xFF800000> : vector<8xf32>
    %337 = vector.multi_reduction <maximumf>, %336, %cst_134 [1] : vector<8x8xf32> to vector<8xf32>
    %338 = vector.shape_cast %337 : vector<8xf32> to vector<8x1xf32>
    %339 = vector.broadcast %338 : vector<8x1xf32> to vector<8x8xf32>
    %340 = arith.subf %336, %339 : vector<8x8xf32>
    %341 = math.exp %340 : vector<8x8xf32>
    %cst_135 = arith.constant dense<0.000000e+00> : vector<8xf32>
    %342 = vector.multi_reduction <add>, %341, %cst_135 [1] : vector<8x8xf32> to vector<8xf32>
    %343 = vector.shape_cast %342 : vector<8xf32> to vector<8x1xf32>
    %344 = tpu.reciprocal %343 {approx = true} : vector<8x1xf32> -> vector<8x1xf32>
    %345 = vector.broadcast %344 : vector<8x1xf32> to vector<8x8xf32>
    %346 = arith.mulf %341, %345 : vector<8x8xf32>
    %cst_136 = arith.constant dense<0.000000e+00> : vector<8x8xf32>
    %347 = tpu.matmul %346, %333, %cst_136 {dimension_numbers = #tpu.dot_dimension_numbers<[1], [0], [0], [1], [0, 0, 1, 1], [], []>} : vector<8x8xf32>, vector<8x8xf32>, vector<8x8xf32> -> vector<8x8xf32>
    %348 = vector.extract_strided_slice %261 {offsets = [8, 8], sizes = [8, 8], strides = [1, 1]} : vector<16x96xf32> to vector<8x8xf32>
    %349 = vector.extract_strided_slice %261 {offsets = [8, 40], sizes = [8, 8], strides = [1, 1]} : vector<16x96xf32> to vector<8x8xf32>
    %350 = vector.extract_strided_slice %261 {offsets = [8, 72], sizes = [8, 8], strides = [1, 1]} : vector<16x96xf32> to vector<8x8xf32>
    "tpu.trace_start"() <{level = 10 : i32, message = "qd,kd->qk"}> : () -> ()
    %cst_137 = arith.constant dense<0.000000e+00> : vector<8x8xf32>
    %351 = tpu.matmul %348, %349, %cst_137 {dimension_numbers = #tpu.dot_dimension_numbers<[1], [1], [0], [0], [0, 0, 1, 0], [], []>} : vector<8x8xf32>, vector<8x8xf32>, vector<8x8xf32> -> vector<8x8xf32>
    "tpu.trace_stop"() : () -> ()
    %cst_138 = arith.constant 0.353553385 : f32
    %352 = vector.broadcast %cst_138 : f32 to vector<8x8xf32>
    %353 = arith.mulf %351, %352 : vector<8x8xf32>
    %cst_139 = arith.constant dense<0xFF800000> : vector<8xf32>
    %354 = vector.multi_reduction <maximumf>, %353, %cst_139 [1] : vector<8x8xf32> to vector<8xf32>
    %355 = vector.shape_cast %354 : vector<8xf32> to vector<8x1xf32>
    %356 = vector.broadcast %355 : vector<8x1xf32> to vector<8x8xf32>
    %357 = arith.subf %353, %356 : vector<8x8xf32>
    %358 = math.exp %357 : vector<8x8xf32>
    %cst_140 = arith.constant dense<0.000000e+00> : vector<8xf32>
    %359 = vector.multi_reduction <add>, %358, %cst_140 [1] : vector<8x8xf32> to vector<8xf32>
    %360 = vector.shape_cast %359 : vector<8xf32> to vector<8x1xf32>
    %361 = tpu.reciprocal %360 {approx = true} : vector<8x1xf32> -> vector<8x1xf32>
    %362 = vector.broadcast %361 : vector<8x1xf32> to vector<8x8xf32>
    %363 = arith.mulf %358, %362 : vector<8x8xf32>
    %cst_141 = arith.constant dense<0.000000e+00> : vector<8x8xf32>
    %364 = tpu.matmul %363, %350, %cst_141 {dimension_numbers = #tpu.dot_dimension_numbers<[1], [0], [0], [1], [0, 0, 1, 1], [], []>} : vector<8x8xf32>, vector<8x8xf32>, vector<8x8xf32> -> vector<8x8xf32>
    %365 = vector.extract_strided_slice %261 {offsets = [8, 16], sizes = [8, 8], strides = [1, 1]} : vector<16x96xf32> to vector<8x8xf32>
    %366 = vector.extract_strided_slice %261 {offsets = [8, 48], sizes = [8, 8], strides = [1, 1]} : vector<16x96xf32> to vector<8x8xf32>
    %367 = vector.extract_strided_slice %261 {offsets = [8, 80], sizes = [8, 8], strides = [1, 1]} : vector<16x96xf32> to vector<8x8xf32>
    "tpu.trace_start"() <{level = 10 : i32, message = "qd,kd->qk"}> : () -> ()
    %cst_142 = arith.constant dense<0.000000e+00> : vector<8x8xf32>
    %368 = tpu.matmul %365, %366, %cst_142 {dimension_numbers = #tpu.dot_dimension_numbers<[1], [1], [0], [0], [0, 0, 1, 0], [], []>} : vector<8x8xf32>, vector<8x8xf32>, vector<8x8xf32> -> vector<8x8xf32>
    "tpu.trace_stop"() : () -> ()
    %cst_143 = arith.constant 0.353553385 : f32
    %369 = vector.broadcast %cst_143 : f32 to vector<8x8xf32>
    %370 = arith.mulf %368, %369 : vector<8x8xf32>
    %cst_144 = arith.constant dense<0xFF800000> : vector<8xf32>
    %371 = vector.multi_reduction <maximumf>, %370, %cst_144 [1] : vector<8x8xf32> to vector<8xf32>
    %372 = vector.shape_cast %371 : vector<8xf32> to vector<8x1xf32>
    %373 = vector.broadcast %372 : vector<8x1xf32> to vector<8x8xf32>
    %374 = arith.subf %370, %373 : vector<8x8xf32>
    %375 = math.exp %374 : vector<8x8xf32>
    %cst_145 = arith.constant dense<0.000000e+00> : vector<8xf32>
    %376 = vector.multi_reduction <add>, %375, %cst_145 [1] : vector<8x8xf32> to vector<8xf32>
    %377 = vector.shape_cast %376 : vector<8xf32> to vector<8x1xf32>
    %378 = tpu.reciprocal %377 {approx = true} : vector<8x1xf32> -> vector<8x1xf32>
    %379 = vector.broadcast %378 : vector<8x1xf32> to vector<8x8xf32>
    %380 = arith.mulf %375, %379 : vector<8x8xf32>
    %cst_146 = arith.constant dense<0.000000e+00> : vector<8x8xf32>
    %381 = tpu.matmul %380, %367, %cst_146 {dimension_numbers = #tpu.dot_dimension_numbers<[1], [0], [0], [1], [0, 0, 1, 1], [], []>} : vector<8x8xf32>, vector<8x8xf32>, vector<8x8xf32> -> vector<8x8xf32>
    %382 = vector.extract_strided_slice %261 {offsets = [8, 24], sizes = [8, 8], strides = [1, 1]} : vector<16x96xf32> to vector<8x8xf32>
    %383 = vector.extract_strided_slice %261 {offsets = [8, 56], sizes = [8, 8], strides = [1, 1]} : vector<16x96xf32> to vector<8x8xf32>
    %384 = vector.extract_strided_slice %261 {offsets = [8, 88], sizes = [8, 8], strides = [1, 1]} : vector<16x96xf32> to vector<8x8xf32>
    "tpu.trace_start"() <{level = 10 : i32, message = "qd,kd->qk"}> : () -> ()
    %cst_147 = arith.constant dense<0.000000e+00> : vector<8x8xf32>
    %385 = tpu.matmul %382, %383, %cst_147 {dimension_numbers = #tpu.dot_dimension_numbers<[1], [1], [0], [0], [0, 0, 1, 0], [], []>} : vector<8x8xf32>, vector<8x8xf32>, vector<8x8xf32> -> vector<8x8xf32>
    "tpu.trace_stop"() : () -> ()
    %cst_148 = arith.constant 0.353553385 : f32
    %386 = vector.broadcast %cst_148 : f32 to vector<8x8xf32>
    %387 = arith.mulf %385, %386 : vector<8x8xf32>
    %cst_149 = arith.constant dense<0xFF800000> : vector<8xf32>
    %388 = vector.multi_reduction <maximumf>, %387, %cst_149 [1] : vector<8x8xf32> to vector<8xf32>
    %389 = vector.shape_cast %388 : vector<8xf32> to vector<8x1xf32>
    %390 = vector.broadcast %389 : vector<8x1xf32> to vector<8x8xf32>
    %391 = arith.subf %387, %390 : vector<8x8xf32>
    %392 = math.exp %391 : vector<8x8xf32>
    %cst_150 = arith.constant dense<0.000000e+00> : vector<8xf32>
    %393 = vector.multi_reduction <add>, %392, %cst_150 [1] : vector<8x8xf32> to vector<8xf32>
    %394 = vector.shape_cast %393 : vector<8xf32> to vector<8x1xf32>
    %395 = tpu.reciprocal %394 {approx = true} : vector<8x1xf32> -> vector<8x1xf32>
    %396 = vector.broadcast %395 : vector<8x1xf32> to vector<8x8xf32>
    %397 = arith.mulf %392, %396 : vector<8x8xf32>
    %cst_151 = arith.constant dense<0.000000e+00> : vector<8x8xf32>
    %398 = tpu.matmul %397, %384, %cst_151 {dimension_numbers = #tpu.dot_dimension_numbers<[1], [0], [0], [1], [0, 0, 1, 1], [], []>} : vector<8x8xf32>, vector<8x8xf32>, vector<8x8xf32> -> vector<8x8xf32>
    %399 = tpu.concatenate %347, %364, %381, %398 in 1 : vector<8x8xf32>, vector<8x8xf32>, vector<8x8xf32>, vector<8x8xf32> -> vector<8x32xf32>
    %400 = tpu.concatenate %330, %399 in 0 : vector<8x32xf32>, vector<8x32xf32> -> vector<16x32xf32>
    %c1_152 = arith.constant 1 : index
    %c0_153 = arith.constant 0 : index
    %c0_154 = arith.constant 0 : index
    %401 = vector.load %arg7[%c1_152, %c0_153, %c0_154] : memref<2x32x32xf32, #tpu.memory_space<vmem>>, vector<1x32x32xf32>
    %402 = vector.shape_cast %401 : vector<1x32x32xf32> to vector<32x32xf32>
    %cst_155 = arith.constant dense<0.000000e+00> : vector<16x32xf32>
    %403 = tpu.matmul %400, %402, %cst_155 {dimension_numbers = #tpu.dot_dimension_numbers<[1], [0], [0], [1], [0, 0, 1, 1], [], []>} : vector<16x32xf32>, vector<32x32xf32>, vector<16x32xf32> -> vector<16x32xf32>
    %c1_156 = arith.constant 1 : index
    %c0_157 = arith.constant 0 : index
    %c0_158 = arith.constant 0 : index
    %404 = vector.load %arg8[%c1_156, %c0_157, %c0_158] : memref<2x1x32xf32, #tpu.memory_space<vmem>>, vector<1x1x32xf32>
    %405 = vector.shape_cast %404 : vector<1x1x32xf32> to vector<1x32xf32>
    %406 = vector.broadcast %405 : vector<1x32xf32> to vector<16x32xf32>
    %407 = arith.addf %403, %406 : vector<16x32xf32>
    %408 = arith.addf %254, %407 : vector<16x32xf32>
    %c1_159 = arith.constant 1 : index
    %c0_160 = arith.constant 0 : index
    %c0_161 = arith.constant 0 : index
    %409 = vector.load %arg9[%c1_159, %c0_160, %c0_161] : memref<2x1x32xf32, #tpu.memory_space<vmem>>, vector<1x1x32xf32>
    %410 = vector.shape_cast %409 : vector<1x1x32xf32> to vector<1x32xf32>
    %c1_162 = arith.constant 1 : index
    %c0_163 = arith.constant 0 : index
    %c0_164 = arith.constant 0 : index
    %411 = vector.load %arg10[%c1_162, %c0_163, %c0_164] : memref<2x1x32xf32, #tpu.memory_space<vmem>>, vector<1x1x32xf32>
    %412 = vector.shape_cast %411 : vector<1x1x32xf32> to vector<1x32xf32>
    %cst_165 = arith.constant dense<0.000000e+00> : vector<16xf32>
    %413 = vector.multi_reduction <add>, %408, %cst_165 [1] : vector<16x32xf32> to vector<16xf32>
    %414 = vector.shape_cast %413 : vector<16xf32> to vector<16x1xf32>
    %cst_166 = arith.constant 3.200000e+01 : f32
    %415 = vector.broadcast %cst_166 : f32 to vector<16x1xf32>
    %416 = arith.divf %414, %415 : vector<16x1xf32>
    %417 = vector.broadcast %416 : vector<16x1xf32> to vector<16x32xf32>
    %418 = arith.subf %408, %417 : vector<16x32xf32>
    %419 = arith.mulf %418, %418 : vector<16x32xf32>
    %cst_167 = arith.constant dense<0.000000e+00> : vector<16xf32>
    %420 = vector.multi_reduction <add>, %419, %cst_167 [1] : vector<16x32xf32> to vector<16xf32>
    %421 = vector.shape_cast %420 : vector<16xf32> to vector<16x1xf32>
    %cst_168 = arith.constant 3.200000e+01 : f32
    %422 = vector.broadcast %cst_168 : f32 to vector<16x1xf32>
    %423 = arith.divf %421, %422 : vector<16x1xf32>
    %424 = vector.broadcast %416 : vector<16x1xf32> to vector<16x32xf32>
    %425 = arith.subf %408, %424 : vector<16x32xf32>
    %cst_169 = arith.constant 9.99999974E-6 : f32
    %426 = vector.broadcast %cst_169 : f32 to vector<16x1xf32>
    %427 = arith.addf %423, %426 : vector<16x1xf32>
    %428 = math.rsqrt %427 : vector<16x1xf32>
    %429 = vector.broadcast %428 : vector<16x1xf32> to vector<16x32xf32>
    %430 = arith.mulf %425, %429 : vector<16x32xf32>
    %431 = vector.broadcast %410 : vector<1x32xf32> to vector<16x32xf32>
    %432 = arith.mulf %430, %431 : vector<16x32xf32>
    %433 = vector.broadcast %412 : vector<1x32xf32> to vector<16x32xf32>
    %434 = arith.addf %432, %433 : vector<16x32xf32>
    %c1_170 = arith.constant 1 : index
    %c0_171 = arith.constant 0 : index
    %c0_172 = arith.constant 0 : index
    %435 = vector.load %arg11[%c1_170, %c0_171, %c0_172] : memref<2x32x64xf32, #tpu.memory_space<vmem>>, vector<1x32x64xf32>
    %436 = vector.shape_cast %435 : vector<1x32x64xf32> to vector<32x64xf32>
    %cst_173 = arith.constant dense<0.000000e+00> : vector<16x64xf32>
    %437 = tpu.matmul %434, %436, %cst_173 {dimension_numbers = #tpu.dot_dimension_numbers<[1], [0], [0], [1], [0, 0, 1, 1], [], []>} : vector<16x32xf32>, vector<32x64xf32>, vector<16x64xf32> -> vector<16x64xf32>
    %c1_174 = arith.constant 1 : index
    %c0_175 = arith.constant 0 : index
    %c0_176 = arith.constant 0 : index
    %438 = vector.load %arg12[%c1_174, %c0_175, %c0_176] : memref<2x1x64xf32, #tpu.memory_space<vmem>>, vector<1x1x64xf32>
    %439 = vector.shape_cast %438 : vector<1x1x64xf32> to vector<1x64xf32>
    %440 = vector.broadcast %439 : vector<1x64xf32> to vector<16x64xf32>
    %441 = arith.addf %437, %440 : vector<16x64xf32>
    %cst_177 = arith.constant 0.000000e+00 : f32
    %442 = vector.broadcast %cst_177 : f32 to vector<16x64xf32>
    %443 = arith.maximumf %441, %442 : vector<16x64xf32>
    %c1_178 = arith.constant 1 : index
    %c0_179 = arith.constant 0 : index
    %c0_180 = arith.constant 0 : index
    %444 = vector.load %arg13[%c1_178, %c0_179, %c0_180] : memref<2x64x32xf32, #tpu.memory_space<vmem>>, vector<1x64x32xf32>
    %445 = vector.shape_cast %444 : vector<1x64x32xf32> to vector<64x32xf32>
    %cst_181 = arith.constant dense<0.000000e+00> : vector<16x32xf32>
    %446 = tpu.matmul %443, %445, %cst_181 {dimension_numbers = #tpu.dot_dimension_numbers<[1], [0], [0], [1], [0, 0, 1, 1], [], []>} : vector<16x64xf32>, vector<64x32xf32>, vector<16x32xf32> -> vector<16x32xf32>
    %c1_182 = arith.constant 1 : index
    %c0_183 = arith.constant 0 : index
    %c0_184 = arith.constant 0 : index
    %447 = vector.load %arg14[%c1_182, %c0_183, %c0_184] : memref<2x1x32xf32, #tpu.memory_space<vmem>>, vector<1x1x32xf32>
    %448 = vector.shape_cast %447 : vector<1x1x32xf32> to vector<1x32xf32>
    %449 = vector.broadcast %448 : vector<1x32xf32> to vector<16x32xf32>
    %450 = arith.addf %446, %449 : vector<16x32xf32>
    %451 = arith.addf %434, %450 : vector<16x32xf32>
    %c1_185 = arith.constant 1 : index
    %c0_186 = arith.constant 0 : index
    %c0_187 = arith.constant 0 : index
    %452 = vector.load %arg15[%c1_185, %c0_186, %c0_187] : memref<2x1x32xf32, #tpu.memory_space<vmem>>, vector<1x1x32xf32>
    %453 = vector.shape_cast %452 : vector<1x1x32xf32> to vector<1x32xf32>
    %c1_188 = arith.constant 1 : index
    %c0_189 = arith.constant 0 : index
    %c0_190 = arith.constant 0 : index
    %454 = vector.load %arg16[%c1_188, %c0_189, %c0_190] : memref<2x1x32xf32, #tpu.memory_space<vmem>>, vector<1x1x32xf32>
    %455 = vector.shape_cast %454 : vector<1x1x32xf32> to vector<1x32xf32>
    %cst_191 = arith.constant dense<0.000000e+00> : vector<16xf32>
    %456 = vector.multi_reduction <add>, %451, %cst_191 [1] : vector<16x32xf32> to vector<16xf32>
    %457 = vector.shape_cast %456 : vector<16xf32> to vector<16x1xf32>
    %cst_192 = arith.constant 3.200000e+01 : f32
    %458 = vector.broadcast %cst_192 : f32 to vector<16x1xf32>
    %459 = arith.divf %457, %458 : vector<16x1xf32>
    %460 = vector.broadcast %459 : vector<16x1xf32> to vector<16x32xf32>
    %461 = arith.subf %451, %460 : vector<16x32xf32>
    %462 = arith.mulf %461, %461 : vector<16x32xf32>
    %cst_193 = arith.constant dense<0.000000e+00> : vector<16xf32>
    %463 = vector.multi_reduction <add>, %462, %cst_193 [1] : vector<16x32xf32> to vector<16xf32>
    %464 = vector.shape_cast %463 : vector<16xf32> to vector<16x1xf32>
    %cst_194 = arith.constant 3.200000e+01 : f32
    %465 = vector.broadcast %cst_194 : f32 to vector<16x1xf32>
    %466 = arith.divf %464, %465 : vector<16x1xf32>
    %467 = vector.broadcast %459 : vector<16x1xf32> to vector<16x32xf32>
    %468 = arith.subf %451, %467 : vector<16x32xf32>
    %cst_195 = arith.constant 9.99999974E-6 : f32
    %469 = vector.broadcast %cst_195 : f32 to vector<16x1xf32>
    %470 = arith.addf %466, %469 : vector<16x1xf32>
    %471 = math.rsqrt %470 : vector<16x1xf32>
    %472 = vector.broadcast %471 : vector<16x1xf32> to vector<16x32xf32>
    %473 = arith.mulf %468, %472 : vector<16x32xf32>
    %474 = vector.broadcast %453 : vector<1x32xf32> to vector<16x32xf32>
    %475 = arith.mulf %473, %474 : vector<16x32xf32>
    %476 = vector.broadcast %455 : vector<1x32xf32> to vector<16x32xf32>
    %477 = arith.addf %475, %476 : vector<16x32xf32>
    %c0_196 = arith.constant 0 : index
    %c0_197 = arith.constant 0 : index
    %478 = vector.load %arg17[%c0_196, %c0_197] : memref<1x32xf32, #tpu.memory_space<vmem>>, vector<1x32xf32>
    %c0_198 = arith.constant 0 : index
    %c0_199 = arith.constant 0 : index
    %479 = vector.load %arg18[%c0_198, %c0_199] : memref<1x32xf32, #tpu.memory_space<vmem>>, vector<1x32xf32>
    %cst_200 = arith.constant dense<0.000000e+00> : vector<16xf32>
    %480 = vector.multi_reduction <add>, %477, %cst_200 [1] : vector<16x32xf32> to vector<16xf32>
    %481 = vector.shape_cast %480 : vector<16xf32> to vector<16x1xf32>
    %cst_201 = arith.constant 3.200000e+01 : f32
    %482 = vector.broadcast %cst_201 : f32 to vector<16x1xf32>
    %483 = arith.divf %481, %482 : vector<16x1xf32>
    %484 = vector.broadcast %483 : vector<16x1xf32> to vector<16x32xf32>
    %485 = arith.subf %477, %484 : vector<16x32xf32>
    %486 = arith.mulf %485, %485 : vector<16x32xf32>
    %cst_202 = arith.constant dense<0.000000e+00> : vector<16xf32>
    %487 = vector.multi_reduction <add>, %486, %cst_202 [1] : vector<16x32xf32> to vector<16xf32>
    %488 = vector.shape_cast %487 : vector<16xf32> to vector<16x1xf32>
    %cst_203 = arith.constant 3.200000e+01 : f32
    %489 = vector.broadcast %cst_203 : f32 to vector<16x1xf32>
    %490 = arith.divf %488, %489 : vector<16x1xf32>
    %491 = vector.broadcast %483 : vector<16x1xf32> to vector<16x32xf32>
    %492 = arith.subf %477, %491 : vector<16x32xf32>
    %cst_204 = arith.constant 9.99999974E-6 : f32
    %493 = vector.broadcast %cst_204 : f32 to vector<16x1xf32>
    %494 = arith.addf %490, %493 : vector<16x1xf32>
    %495 = math.rsqrt %494 : vector<16x1xf32>
    %496 = vector.broadcast %495 : vector<16x1xf32> to vector<16x32xf32>
    %497 = arith.mulf %492, %496 : vector<16x32xf32>
    %498 = vector.broadcast %478 : vector<1x32xf32> to vector<16x32xf32>
    %499 = arith.mulf %497, %498 : vector<16x32xf32>
    %500 = vector.broadcast %479 : vector<1x32xf32> to vector<16x32xf32>
    %501 = arith.addf %499, %500 : vector<16x32xf32>
    %c0_205 = arith.constant 0 : index
    %c0_206 = arith.constant 0 : index
    %502 = vector.load %arg19[%c0_205, %c0_206] : memref<32x16xf32, #tpu.memory_space<vmem>>, vector<32x16xf32>
    %cst_207 = arith.constant dense<0.000000e+00> : vector<16x16xf32>
    %503 = tpu.matmul %501, %502, %cst_207 {dimension_numbers = #tpu.dot_dimension_numbers<[1], [0], [0], [1], [0, 0, 1, 1], [], []>} : vector<16x32xf32>, vector<32x16xf32>, vector<16x16xf32> -> vector<16x16xf32>
    %c0_208 = arith.constant 0 : index
    %c0_209 = arith.constant 0 : index
    %504 = vector.load %arg20[%c0_208, %c0_209] : memref<1x16xf32, #tpu.memory_space<vmem>>, vector<1x16xf32>
    %505 = vector.broadcast %504 : vector<1x16xf32> to vector<16x16xf32>
    %506 = arith.addf %503, %505 : vector<16x16xf32>
    %cst_210 = arith.constant 0.000000e+00 : f32
    %507 = vector.broadcast %cst_210 : f32 to vector<16x16xf32>
    %508 = arith.maximumf %506, %507 : vector<16x16xf32>
    %c0_211 = arith.constant 0 : index
    %c0_212 = arith.constant 0 : index
    %509 = vector.load %arg21[%c0_211, %c0_212] : memref<16x5xf32, #tpu.memory_space<vmem>>, vector<16x5xf32>
    %cst_213 = arith.constant dense<0.000000e+00> : vector<16x5xf32>
    %510 = tpu.matmul %508, %509, %cst_213 {dimension_numbers = #tpu.dot_dimension_numbers<[1], [0], [0], [1], [0, 0, 1, 1], [], []>} : vector<16x16xf32>, vector<16x5xf32>, vector<16x5xf32> -> vector<16x5xf32>
    %c0_214 = arith.constant 0 : index
    %c0_215 = arith.constant 0 : index
    %511 = vector.load %arg22[%c0_214, %c0_215] : memref<1x5xf32, #tpu.memory_space<vmem>>, vector<1x5xf32>
    %512 = vector.broadcast %511 : vector<1x5xf32> to vector<16x5xf32>
    %513 = arith.addf %510, %512 : vector<16x5xf32>
    %c0_216 = arith.constant 0 : index
    %c0_217 = arith.constant 0 : index
    %514 = vector.load %arg23[%c0_216, %c0_217] : memref<16x5xf32, #tpu.memory_space<vmem>>, vector<16x5xf32>
    tpu.vector_store %arg23[%c0_216, %c0_217], %513 {strides = array<i32>} : memref<16x5xf32, #tpu.memory_space<vmem>>, vector<16x5xf32>,
    return
  }
}

</mosaic_0001>

<bundles_post_ra>
// kernel: fatigue_regression_forward.1
= control target key start
LH: loop header
LB: loop body
LE: loop exit
PB: predicated region body
PF: predicated region fallthrough
CT: control target
= control target key end

     0   :  { %vm86_vm0 = vcmask 171008   ;;  %vm93_vm1 = vcmask 1044480   ;;  %vm176_vm2 = vcmask 261120   ;;  %v4863_v47 = vmov 0.0   ;;  %s5668_s26 = smov 120   ;;  %s5662_s27 = smov 104   ;;  %s5623_s1 = inlined_call_operand.vmem [shape: f32[21,32], index: 1, kind: input, shape index: {}]   ;;  %s5624_s0 = inlined_call_operand.vmem [shape: f32[16,21], index: 0, kind: input, shape index: {}]   ;;  %s5625_s2 = inlined_call_operand.vmem [shape: f32[1,32], index: 2, kind: input, shape index: {}]   ;;  %s5626_s5 = inlined_call_operand.vmem [shape: f32[2,32,96], index: 5, kind: input, shape index: {}]   ;;  %s5627_s3 = inlined_call_operand.vmem [shape: f32[1,32], index: 3, kind: input, shape index: {}]   ;;  %s5628_s4 = inlined_call_operand.vmem [shape: f32[1,32], index: 4, kind: input, shape index: {}]   ;;  %s5629_s6 = inlined_call_operand.vmem [shape: f32[2,1,96], index: 6, kind: input, shape index: {}]   ;;  %s5630_s7 = inlined_call_operand.vmem [shape: f32[2,32,32], index: 7, kind: input, shape index: {}]   ;;  %s5631_s8 = inlined_call_operand.vmem [shape: f32[2,1,32], index: 8, kind: input, shape index: {}]   ;;  %s5632_s11 = inlined_call_operand.vmem [shape: f32[2,32,64], index: 11, kind: input, shape index: {}]   ;;  %s5633_s13 = inlined_call_operand.vmem [shape: f32[2,64,32], index: 13, kind: input, shape index: {}]   ;;  %s5634_s9 = inlined_call_operand.vmem [shape: f32[2,1,32], index: 9, kind: input, shape index: {}]   ;;  %s5635_s10 = inlined_call_operand.vmem [shape: f32[2,1,32], index: 10, kind: input, shape index: {}]   ;;  %s5636_s12 = inlined_call_operand.vmem [shape: f32[2,1,64], index: 12, kind: input, shape index: {}]   ;;  %s5637_s14 = inlined_call_operand.vmem [shape: f32[2,1,32], index: 14, kind: input, shape index: {}]   ;;  %s5638_s15 = inlined_call_operand.vmem [shape: f32[2,1,32], index: 15, kind: input, shape index: {}]   ;;  %s5639_s16 = inlined_call_operand.vmem [shape: f32[2,1,32], index: 16, kind: input, shape index: {}]   ;;  %s5640_s19 = inlined_call_operand.vmem [shape: f32[32,16], index: 19, kind: input, shape index: {}]   ;;  %s5641_s17 = inlined_call_operand.vmem [shape: f32[1,32], index: 17, kind: input, shape index: {}]   ;;  %s5642_s18 = inlined_call_operand.vmem [shape: f32[1,32], index: 18, kind: input, shape index: {}]   ;;  %s5643_s21 = inlined_call_operand.vmem [shape: f32[16,5], index: 21, kind: input, shape index: {}]   ;;  %s5644_s20 = inlined_call_operand.vmem [shape: f32[1,16], index: 20, kind: input, shape index: {}]   ;;  %s5645_s22 = inlined_call_operand.vmem [shape: f32[1,5], index: 22, kind: input, shape index: {}]   ;;  %s5646_s23 = inlined_call_operand.vmem [shape: f32[16,5], index: 23, kind: output, shape index: {}]  }
   0x1   :  { %5676 = sst [smem:[#allocation2_spill]] %s5623_s1  ;;  %vm4864_vm3 = vmmov 0   ;;  %vm315_vm4 = vcmask 64512   ;;  %s5656_s29 = smov 48   ;;  %vm989_vm5 = vcmask 130048   ;;  %vm991_vm6 = vcmask 195584  }
   0x2   :  { %5677 = sst [smem:[#allocation3_spill]] %s5624_s0  ;;  %s5684_s24 = sld [smem:[#allocation2_spill]]  ;;  %vm1918_vm7 = vcmask 523264   ;;  %vm4108_vm8 = vcmask 39936  }
   0x3   :  { %5678 = sst [smem:[#allocation4_spill]] %s5625_s2  ;;  %s5685_s2 = sld [smem:[#allocation3_spill]] }
   0x4   :  { %5679 = sst [smem:[#allocation5_spill]] %s5626_s5  ;;  %s5686_s1 = sld [smem:[#allocation4_spill]] }
   0x5   :  { %5680 = sst [smem:[#allocation6_spill]] %s5627_s3  ;;  %s4866_s0 = smov 96  }
   0x6   :  { %5681 = sst [smem:[#allocation7_spill]] %s5628_s4  ;;  %s5688_s28 = sld [smem:[#allocation6_spill]] }
   0x7   :  { %5682 = sst [smem:[#allocation8_spill]] %s5629_s6  ;;  %s4865_s4 = smov 88  }
   0x8   :  { %5683 = sst [smem:[#allocation9_spill]] %s5630_s7  ;;  %v76_v0 = vld [vmem:[%s5684_s24] sm:$0xff]  ;;  %v77_v1 = vld [vmem:[%s5684_s24 + $0x8] sm:$0xff]  ;;  %v78_v4 = vld [vmem:[%s5684_s24 + $0x10] sm:$0x1f]  ;;  %s5687_s24 = sld [smem:[#allocation5_spill]] }
   0x9   :  { %v4663_v2 = vpack.c.bf16 %v77_v1, %v76_v0  ;;  %v74_v3 = vld [vmem:[%s5685_s2] sm:$0xff]  ;;  %v75_v5 = vld [vmem:[%s5685_s2 + $0x8] sm:$0xff]  ;;  %s5690_s25 = sld [smem:[#allocation8_spill]]  ;;  %s5666_s2 = smov 112  }
   0xa   :  { %4378 = vmatprep.mubr.msk.f32.mxu0 %vm86_vm0, %v74_v3  ;;  %v4115_v6 = vld [vmem:[%s5686_s1] ss:$0 sm:$0xff]  ;;  %s5689_s1 = sld [smem:[#allocation7_spill]]  ;;  %s5664_s6 = smov 80  }
   0xb   :  { %4664 = vmatprep.subr.bf16.mxu0 %v4663_v2  ;;  %s5660_s7 = smov 72   ;;  %s5654_s5 = smov 40  }
   0xc   :  { %4666 = vmatpush3.bf16.msra.mxu0 %v4663_v2  ;;  %v4119_v38 = vld [vmem:[%s5688_s28] ss:$0 sm:$0xff]  ;;  %s5658_s28 = smov 64   ;;  %s5674_s3 = smov 8  }
   0xd   :  { %4376 = vmatprep.subr.msk.mxu0 %vm93_vm1, %v78_v4 }
   0xe   :  { %v220_v25 = vld [vmem:[%s5687_s24] sm:$0xff]  ;;  %v221_v26 = vld [vmem:[%s5687_s24 + $0x8] sm:$0xff]  ;;  %v222_v27 = vld [vmem:[%s5687_s24 + $0x10] sm:$0xff] }
   0xf   :  { %v4667_v28 = vpack.c.bf16 %v221_v26, %v220_v25  ;;  %v223_v29 = vld [vmem:[%s5687_s24 + $0x18] sm:$0xff]  ;;  %v4121_v48 = vld [vmem:[%s5690_s25] ss:$0 sm:$0xff] }
  0x10   :  { %4377 = vmatpush3.msk.msra.mxu0 %vm93_vm1, %v78_v4  ;;  %v4671_v30 = vpack.c.bf16 %v223_v29, %v222_v27  ;;  %v4120_v40 = vld [vmem:[%s5689_s1] ss:$0 sm:$0xff]  ;;  %s5652_s1 = smov 56  }
  0x11   :  { %4379 = vmatmul.mubr.msk.f32.vlgmr.msra.gmra.mrb[0].mxu0 %vm86_vm0, %v75_v5  ;;  %4668 = vmatprep.subr.bf16.mxu1 %v4667_v28 }
  0x12   :  { %4670 = vmatpush3.bf16.msra.mxu1 %v4667_v28  ;;  %4392 = vmatprep.subr.mxu0 %v4863_v47 }
  0x13   :  { %4672 = vmatprep.subr.bf16.mxu1 %v4671_v30  ;;  %4394 = vmatprep.mubr.msk.f32.mxu0 %vm4864_vm3, %v4863_v47 }
  0x16   :  { %4674 = vmatpush3.bf16.msra.mxu1 %v4671_v30 }
  0x17   :  { %4397 = vmatprep.subr.mxu1 %v4863_v47 }
  0xe4   :  { %v4380_v7 = vpop.f32.mrb[0].mxu0 }
  0xe5   :  { %v163_v8 = vpop.f32.mrb[1].mxu0  ;;  %v169_v9 = vadd.f32 %v4380_v7, %v4115_v6 }
  0xe6   :  { %v164_v10 = vadd.f32 %v4115_v6, %v163_v8 }
  0xe7   :  { %v173_v12 = vmax.f32 %v169_v9, 0.0 }
  0xe8   :  { %v172_v11 = vmax.f32 %v164_v10, 0.0 }
  0xe9   :  { %v180_v14 = vsel %vm176_vm2, %v173_v12, 0.0 }
  0xea   :  { %v177_v13 = vsel %vm176_vm2, %v172_v11, 0.0 }
  0xeb   :  { %178 = vadd.xlane.f32.xlu0 %v177_v13 }
  0xef   :  { %181 = vadd.xlane.f32.xlu0 %v180_v14 }
 0x178   :  { %v179_v15 = vpop.xlane.xlu0 %178 }
 0x179   :  { %v184_v16 = vmul.f32 0.03125, %v179_v15 }
 0x17b   :  { %v186_v17 = vsub.f32 %v172_v11, %v184_v16 }
 0x17c   :  { %v182_v18 = vpop.xlane.xlu0 %181 }
 0x17d   :  { %v185_v19 = vmul.f32 0.03125, %v182_v18  ;;  %v188_v20 = vmul.f32 %v186_v17, %v186_v17 }
 0x17f   :  { %v187_v21 = vsub.f32 %v173_v12, %v185_v19  ;;  %v190_v22 = vsel %vm176_vm2, %v188_v20, 0.0 }
 0x180   :  { %191 = vadd.xlane.f32.xlu1 %v190_v22 }
 0x181   :  { %v189_v23 = vmul.f32 %v187_v21, %v187_v21 }
 0x183   :  { %v193_v24 = vsel %vm176_vm2, %v189_v23, 0.0 }
 0x184   :  { %194 = vadd.xlane.f32.xlu1 %v193_v24 }
 0x20d   :  { %v192_v31 = vpop.xlane.xlu1 %191 }
 0x20e   :  { %v196_v32 = vmul.f32 0.03125, %v192_v31 }
 0x210   :  { %v198_v33 = vadd.f32 1e-05, %v196_v32 }
 0x211   :  { %v195_v34 = vpop.xlane.xlu1 %194 }
 0x212   :  { %4775 = vrsqrt.f32 %v198_v33  ;;  %v197_v35 = vmul.f32 0.03125, %v195_v34 }
 0x214   :  { %v199_v36 = vadd.f32 1e-05, %v197_v35 }
 0x216   :  { %4777 = vrsqrt.f32 %v199_v36 }
 0x21c   :  { %v4776_v37 = vpop.eup %4775 }
 0x21d   :  { %v202_v39 = vmul.f32 %v4776_v37, %v186_v17 }
 0x21f   :  { %v210_v41 = vmul.f32 %v4119_v38, %v202_v39 }
 0x220   :  { %v4778_v42 = vpop.eup %4777 }
 0x221   :  { %v203_v43 = vmul.f32 %v4778_v42, %v187_v21  ;;  %v5039_v44 = vadd.f32 %v4120_v40, %v210_v41 }
 0x223   :  { %v211_v45 = vmul.f32 %v4119_v38, %v203_v43  ;;  %4389 = vmatprep.mubr.msk.f32.mxu1 %vm176_vm2, %v5039_v44 }
 0x225   :  { %v5043_v46 = vadd.f32 %v4120_v40, %v211_v45 }
 0x227   :  { %4390 = vmatmul.mubr.msk.f32.vlgmr.msra.gmra.mrb[0].mxu1 %vm176_vm2, %v5043_v46 }
 0x228   :  { %4399 = vmatprep.mubr.msk.f32.mxu1 %vm4864_vm3, %v4863_v47 }
 0x2fa   :  { %v4391_v49 = vpop.f32.mrb[0].mxu1 }
 0x2fb   :  { %v303_v50 = vpop.f32.mrb[1].mxu1  ;;  %v5070_v52 = vadd.f32 %v4391_v49, %v4121_v48 }
 0x2fc   :  { %v5056_v51 = vadd.f32 %v4121_v48, %v303_v50 }
 0x2fe   :  { %480 = vrot.lane.b32.xlu1 %v5056_v51, %s4865_s4  ;;  %313 = vrot.lane.b32.xlu0 %v5056_v51, %s4866_s0 }
 0x302   :  { %478 = vrot.lane.b32.xlu1 %v5056_v51, %s5668_s26  ;;  %644 = vrot.lane.b32.xlu0 %v5056_v51, %s5666_s2 }
 0x306   :  { %646 = vrot.lane.b32.xlu1 %v5056_v51, %s5664_s6  ;;  %810 = vrot.lane.b32.xlu0 %v5056_v51, %s5662_s27 }
 0x30a   :  { %812 = vrot.lane.b32.xlu1 %v5056_v51, %s5660_s7  ;;  %1160 = vrot.lane.b32.xlu0 %v5070_v52, %s4865_s4 }
 0x30e   :  { %994 = vrot.lane.b32.xlu1 %v5070_v52, %s4866_s0  ;;  %1326 = vrot.lane.b32.xlu0 %v5070_v52, %s5664_s6  ;;  %s5696_s6 = smov 72  }
 0x312   :  { %1158 = vrot.lane.b32.xlu1 %v5070_v52, %s5668_s26  ;;  %1492 = vrot.lane.b32.xlu0 %v5070_v52, %s5660_s7  ;;  %s5672_s7 = smov 16   ;;  %s5692_s26 = smov 120  }
 0x316   :  { %1324 = vrot.lane.b32.xlu1 %v5070_v52, %s5666_s2  ;;  %s5694_s2 = smov 80  }
 0x31a   :  { %1490 = vrot.lane.b32.xlu1 %v5070_v52, %s5662_s27  ;;  %s5699_s27 = smov 40  }
 0x370   :  { %v481_v53 = vpop.permute.xlu1 %480  ;;  %v314_v54 = vpop.permute.xlu0 %313 }
 0x371   :  { %4393 = vmatpush3.xpose.msk.msra.mxu0 %vm315_vm4, %v314_v54 }
 0x372   :  { %4402 = vmatprep.subr.mxu0 %v4863_v47 }
 0x374   :  { %v479_v55 = vpop.permute.xlu1 %478  ;;  %4395 = vmatmul.mubr.msk.f32.vlgmr.msra.gmra.mrb[2].mxu0 %vm315_vm4, %v5056_v51  ;;  %v645_v56 = vpop.permute.xlu0 %644 }
 0x375   :  { %4403 = vmatpush3.xpose.msk.msra.mxu0 %vm315_vm4, %v481_v53  ;;  %4404 = vmatprep.mubr.msk.f32.mxu0 %vm4864_vm3, %v4863_v47 }
 0x376   :  { %4412 = vmatprep.subr.mxu0 %v4863_v47 }
 0x378   :  { %v647_v57 = vpop.permute.xlu1 %646  ;;  %4405 = vmatmul.mubr.msk.f32.vlgmr.msra.gmra.mrb[4].mxu0 %vm315_vm4, %v479_v55  ;;  %v811_v58 = vpop.permute.xlu0 %810 }
 0x379   :  { %4413 = vmatpush3.xpose.msk.msra.mxu0 %vm315_vm4, %v647_v57  ;;  %4414 = vmatprep.mubr.msk.f32.mxu0 %vm4864_vm3, %v4863_v47 }
 0x37a   :  { %4422 = vmatprep.subr.mxu0 %v4863_v47 }
 0x37c   :  { %v813_v59 = vpop.permute.xlu1 %812  ;;  %4415 = vmatmul.mubr.msk.f32.vlgmr.msra.gmra.mrb[6].mxu0 %vm315_vm4, %v645_v56  ;;  %v1161_v60 = vpop.permute.xlu0 %1160 }
 0x37d   :  { %4423 = vmatpush3.xpose.msk.msra.mxu0 %vm315_vm4, %v813_v59  ;;  %4424 = vmatprep.mubr.msk.f32.mxu0 %vm4864_vm3, %v4863_v47 }
 0x37e   :  { %4432 = vmatprep.subr.mxu0 %v4863_v47 }
 0x380   :  { %v995_v61 = vpop.permute.xlu1 %994  ;;  %4425 = vmatmul.mubr.msk.f32.vlgmr.msra.gmra.mrb[8].mxu0 %vm315_vm4, %v811_v58  ;;  %v1327_v63 = vpop.permute.xlu0 %1326 }
 0x381   :  { %4433 = vmatpush3.xpose.msk.msra.mxu0 %vm315_vm4, %v995_v61  ;;  %4434 = vmatprep.mubr.msk.f32.mxu0 %vm4864_vm3, %v4863_v47 }
 0x382   :  { %4442 = vmatprep.subr.mxu0 %v4863_v47 }
 0x384   :  { %v1159_v62 = vpop.permute.xlu1 %1158  ;;  %4435 = vmatmul.mubr.msk.f32.vlgmr.msra.gmra.mrb[10].mxu0 %vm315_vm4, %v5070_v52  ;;  %v1493_v1 = vpop.permute.xlu0 %1492 }
 0x385   :  { %4443 = vmatpush3.xpose.msk.msra.mxu0 %vm315_vm4, %v1161_v60  ;;  %4444 = vmatprep.mubr.msk.f32.mxu0 %vm4864_vm3, %v4863_v47 }
 0x386   :  { %4452 = vmatprep.subr.mxu0 %v4863_v47 }
 0x388   :  { %4445 = vmatmul.mubr.msk.f32.vlgmr.msra.gmra.mrb[12].mxu0 %vm315_vm4, %v1159_v62  ;;  %v1325_v0 = vpop.permute.xlu1 %1324 }
 0x389   :  { %4453 = vmatpush3.xpose.msk.msra.mxu0 %vm315_vm4, %v1327_v63  ;;  %4454 = vmatprep.mubr.msk.f32.mxu0 %vm4864_vm3, %v4863_v47 }
 0x38a   :  { %4462 = vmatprep.subr.mxu0 %v4863_v47 }
 0x38c   :  { %4455 = vmatmul.mubr.msk.f32.vlgmr.msra.gmra.mrb[14].mxu0 %vm315_vm4, %v1325_v0  ;;  %v1491_v2 = vpop.permute.xlu1 %1490 }
 0x38d   :  { %4463 = vmatpush3.xpose.msk.msra.mxu0 %vm315_vm4, %v1493_v1  ;;  %4464 = vmatprep.mubr.msk.f32.mxu0 %vm4864_vm3, %v4863_v47 }
 0x390   :  { %4465 = vmatmul.mubr.msk.f32.vlgmr.msra.gmra.mrb[16].mxu0 %vm315_vm4, %v1491_v2 }
 0x447   :  { %v386_v3 = vpop.f32.mrb[2].mxu0 }
 0x448   :  { %v390_v4 = vmul.f32 0.35355338, %v386_v3  ;;  %v4396_v5 = vpop.f32.mrb[3].mxu0 }
 0x44a   :  { %v391_v6 = vsel %vm315_vm4, %v390_v4, -inf }
 0x44b   :  { %392 = vmax.xlane.f32.xlu0 %v391_v6  ;;  %v552_v7 = vpop.f32.mrb[4].mxu0 }
 0x44c   :  { %v556_v8 = vmul.f32 0.35355338, %v552_v7  ;;  %v4406_v9 = vpop.f32.mrb[5].mxu0 }
 0x44e   :  { %v557_v10 = vsel %vm315_vm4, %v556_v8, -inf }
 0x44f   :  { %558 = vmax.xlane.f32.xlu1 %v557_v10  ;;  %v718_v11 = vpop.f32.mrb[6].mxu0 }
 0x450   :  { %v5129_v12 = vmul.f32 0.35355338, %v718_v11  ;;  %v4416_v13 = vpop.f32.mrb[7].mxu0 }
 0x452   :  { %v723_v14 = vsel %vm315_vm4, %v5129_v12, -inf }
 0x453   :  { %724 = vmax.xlane.f32.xlu0 %v723_v14  ;;  %v884_v15 = vpop.f32.mrb[8].mxu0 }
 0x454   :  { %v888_v16 = vmul.f32 0.35355338, %v884_v15  ;;  %v4426_v17 = vpop.f32.mrb[9].mxu0 }
 0x456   :  { %v889_v18 = vsel %vm315_vm4, %v888_v16, -inf }
 0x457   :  { %890 = vmax.xlane.f32.xlu0 %v889_v18  ;;  %v1066_v19 = vpop.f32.mrb[10].mxu0 }
 0x458   :  { %v1070_v20 = vmul.f32 0.35355338, %v1066_v19  ;;  %v4436_v21 = vpop.f32.mrb[11].mxu0 }
 0x45a   :  { %v1071_v22 = vsel %vm315_vm4, %v1070_v20, -inf }
 0x45b   :  { %1072 = vmax.xlane.f32.xlu0 %v1071_v22  ;;  %v1232_v23 = vpop.f32.mrb[12].mxu0 }
 0x45c   :  { %v1236_v24 = vmul.f32 0.35355338, %v1232_v23  ;;  %v4446_v25 = vpop.f32.mrb[13].mxu0 }
 0x45e   :  { %v1237_v26 = vsel %vm315_vm4, %v1236_v24, -inf }
 0x45f   :  { %1238 = vmax.xlane.f32.xlu1 %v1237_v26  ;;  %v1398_v27 = vpop.f32.mrb[14].mxu0 }
 0x460   :  { %v1402_v28 = vmul.f32 0.35355338, %v1398_v27  ;;  %v4456_v29 = vpop.f32.mrb[15].mxu0 }
 0x462   :  { %v1403_v30 = vsel %vm315_vm4, %v1402_v28, -inf }
 0x463   :  { %1404 = vmax.xlane.f32.xlu0 %v1403_v30  ;;  %v1564_v31 = vpop.f32.mrb[16].mxu0 }
 0x464   :  { %v4466_v32 = vpop.f32.mrb[17].mxu0  ;;  %v1568_v33 = vmul.f32 0.35355338, %v1564_v31 }
 0x466   :  { %v1569_v34 = vsel %vm315_vm4, %v1568_v33, -inf }
 0x470   :  { %402 = vrot.lane.b32.xlu1 %v5056_v51, %s5658_s28 }
 0x494   :  { %1570 = vmax.xlane.f32.xlu1 %v1569_v34 }
 0x4a5   :  { %734 = vrot.lane.b32.xlu1 %v5056_v51, %s5656_s29 }
 0x4a9   :  { %900 = vrot.lane.b32.xlu1 %v5056_v51, %s5654_s5 }
 0x4ad   :  { %1082 = vrot.lane.b32.xlu1 %v5070_v52, %s5658_s28  ;;  %s5670_s28 = smov 24  }
 0x4d8   :  { %v393_v35 = vpop.xlane.xlu0 %392 }
 0x4d9   :  { %v394_v36 = vsub.f32 %v390_v4, %v393_v35 }
 0x4db   :  { %v395_v37 = vmul.f32 1.442695, %v394_v36 }
 0x4dc   :  { %v559_v38 = vpop.xlane.xlu1 %558 }
 0x4dd   :  { %4779 = vpow2.f32 %v395_v37  ;;  %v560_v39 = vsub.f32 %v556_v8, %v559_v38 }
 0x4df   :  { %v561_v40 = vmul.f32 1.442695, %v560_v39 }
 0x4e0   :  { %v725_v41 = vpop.xlane.xlu0 %724 }
 0x4e1   :  { %4781 = vpow2.f32 %v561_v40  ;;  %v726_v58 = vsub.f32 %v5129_v12, %v725_v41 }
 0x4e3   :  { %v727_v60 = vmul.f32 1.442695, %v726_v58 }
 0x4e4   :  { %v891_v42 = vpop.xlane.xlu0 %890 }
 0x4e5   :  { %v892_v43 = vsub.f32 %v888_v16, %v891_v42 }
 0x4e7   :  { %v4780_v45 = vpop.eup %4779  ;;  %v893_v48 = vmul.f32 1.442695, %v892_v43 }
 0x4e8   :  { %v397_v49 = vsel %vm315_vm4, %v4780_v45, 0.0  ;;  %v1073_v59 = vpop.xlane.xlu0 %1072 }
 0x4e9   :  { %4783 = vpow2.f32 %v893_v48  ;;  %398 = vadd.xlane.f32.xlu0 %v397_v49  ;;  %v1074_v61 = vsub.f32 %v1070_v20, %v1073_v59 }
 0x4ea   :  { %4785 = vpow2.f32 %v727_v60 }
 0x4eb   :  { %v4782_v50 = vpop.eup %4781  ;;  %v1075_v63 = vmul.f32 1.442695, %v1074_v61 }
 0x4ec   :  { %v1239_v53 = vpop.xlane.xlu1 %1238  ;;  %v563_v54 = vsel %vm315_vm4, %v4782_v50, 0.0 }
 0x4ed   :  { %564 = vadd.xlane.f32.xlu1 %v563_v54  ;;  %4787 = vpow2.f32 %v1075_v63  ;;  %v1240_v1 = vsub.f32 %v1236_v24, %v1239_v53 }
 0x4ef   :  { %v1241_v3 = vmul.f32 1.442695, %v1240_v1 }
 0x4f0   :  { %v403_v55 = vpop.permute.xlu1 %402  ;;  %v1405_v62 = vpop.xlane.xlu0 %1404 }
 0x4f1   :  { %4398 = vmatpush3.msra.mxu1 %v403_v55  ;;  %v1406_v0 = vsub.f32 %v1402_v28, %v1405_v62 }
 0x4f2   :  { %4407 = vmatprep.subr.mxu1 %v4863_v47 }
 0x4f3   :  { %v5149_v56 = vpop.eup %4783  ;;  %v1407_v2 = vmul.f32 1.442695, %v1406_v0 }
 0x4f4   :  { %v895_v57 = vsel %vm315_vm4, %v5149_v56, 0.0  ;;  %v4786_v4 = vpop.eup %4785 }
 0x4f5   :  { %896 = vadd.xlane.f32.xlu1 %v895_v57  ;;  %4789 = vpow2.f32 %v1407_v2 }
 0x4f6   :  { %4791 = vpow2.f32 %v1241_v3 }
 0x4f7   :  { %v4788_v5 = vpop.eup %4787 }
 0x4f8   :  { %v1077_v7 = vsel %vm315_vm4, %v4788_v5, 0.0 }
 0x4ff   :  { %568 = vrot.lane.b32.xlu0 %v5056_v51, %s5652_s1  ;;  %v729_v51 = vsel %vm315_vm4, %v4786_v4, 0.0  ;;  %v5160_v8 = vpop.eup %4789 }
 0x500   :  { %v1409_v11 = vsel %vm315_vm4, %v5160_v8, 0.0  ;;  %v4792_v12 = vpop.eup %4791 }
 0x501   :  { %v1243_v13 = vsel %vm315_vm4, %v4792_v12, 0.0 }
 0x506   :  { %1248 = vrot.lane.b32.xlu1 %v5070_v52, %s5652_s1 }
 0x51e   :  { %730 = vadd.xlane.f32.xlu0 %v729_v51 }
 0x521   :  { %v1571_v6 = vpop.xlane.xlu1 %1570 }
 0x522   :  { %v1572_v9 = vsub.f32 %v1568_v33, %v1571_v6  ;;  %1078 = vadd.xlane.f32.xlu0 %v1077_v7 }
 0x524   :  { %v1573_v10 = vmul.f32 1.442695, %v1572_v9 }
 0x525   :  { %v735_v16 = vpop.permute.xlu1 %734 }
 0x526   :  { %4793 = vpow2.f32 %v1573_v10  ;;  %1410 = vadd.xlane.f32.xlu0 %v1409_v11 }
 0x529   :  { %v901_v17 = vpop.permute.xlu1 %900 }
 0x52a   :  { %1244 = vadd.xlane.f32.xlu1 %v1243_v13 }
 0x52d   :  { %v1083_v18 = vpop.permute.xlu1 %1082 }
 0x530   :  { %v5165_v14 = vpop.eup %4793 }
 0x531   :  { %v1575_v15 = vsel %vm315_vm4, %v5165_v14, 0.0 }
 0x532   :  { %1576 = vadd.xlane.f32.xlu0 %v1575_v15 }
 0x53b   :  { %1580 = vrot.lane.b32.xlu1 %v5070_v52, %s5654_s5  ;;  %s5691_s5 = sld [smem:[#allocation9_spill]] }
 0x541   :  { %v1671_v55 = vld [vmem:[%s5691_s5] sm:$0xff]  ;;  %v1673_v60 = vld [vmem:[%s5691_s5 + $0x10] sm:$0xff]  ;;  %v1674_v61 = vld [vmem:[%s5691_s5 + $0x18] sm:$0xff] }
 0x542   :  { %v4679_v63 = vpack.c.bf16 %v1674_v61, %v1673_v60 }
 0x548   :  { %1414 = vrot.lane.b32.xlu0 %v5070_v52, %s5656_s29 }
 0x576   :  { %v399_v19 = vpop.xlane.xlu0 %398 }
 0x577   :  { %4795 = vrcp.f32 %v399_v19 }
 0x57a   :  { %v565_v20 = vpop.xlane.xlu1 %564  ;;  %v569_v23 = vpop.permute.xlu0 %568 }
 0x57b   :  { %4797 = vrcp.f32 %v565_v20  ;;  %v4148_v20 = vld [vmem:[%s5631_s8] ss:$0 sm:$0xff] }
 0x581   :  { %v4796_v21 = vpop.eup %4795 }
 0x582   :  { %v401_v22 = vmul.f32 %v4796_v21, %v4780_v45  ;;  %v897_v52 = vpop.xlane.xlu1 %896 }
 0x584   :  { %4400 = vmatmul.mubr.msk.f32.vlgmr.msra.gmra.mrb[2].mxu1 %vm315_vm4, %v401_v22 }
 0x585   :  { %v4798_v24 = vpop.eup %4797  ;;  %4408 = vmatpush3.msra.mxu1 %v569_v23  ;;  %4409 = vmatprep.mubr.msk.f32.mxu1 %vm4864_vm3, %v4863_v47 }
 0x586   :  { %v567_v25 = vmul.f32 %v4798_v24, %v4782_v50  ;;  %4417 = vmatprep.subr.mxu1 %v4863_v47  ;;  %v1249_v28 = vpop.permute.xlu1 %1248 }
 0x588   :  { %4410 = vmatmul.mubr.msk.f32.vlgmr.msra.gmra.mrb[4].mxu1 %vm315_vm4, %v567_v25 }
 0x589   :  { %4418 = vmatpush3.msra.mxu1 %v735_v16  ;;  %4419 = vmatprep.mubr.msk.f32.mxu1 %vm4864_vm3, %v4863_v47 }
 0x58a   :  { %4427 = vmatprep.subr.mxu1 %v4863_v47 }
 0x5ab   :  { %v731_v26 = vpop.xlane.xlu0 %730 }
 0x5ac   :  { %4799 = vrcp.f32 %v731_v26 }
 0x5ad   :  { %4801 = vrcp.f32 %v897_v52 }
 0x5af   :  { %v1079_v27 = vpop.xlane.xlu0 %1078 }
 0x5b0   :  { %4803 = vrcp.f32 %v1079_v27 }
 0x5b3   :  { %v1411_v31 = vpop.xlane.xlu0 %1410 }
 0x5b6   :  { %v4800_v29 = vpop.eup %4799 }
 0x5b7   :  { %v733_v30 = vmul.f32 %v4800_v29, %v4786_v4  ;;  %v1245_v32 = vpop.xlane.xlu1 %1244  ;;  %v4802_v33 = vpop.eup %4801 }
 0x5b8   :  { %4805 = vrcp.f32 %v1245_v32  ;;  %v899_v34 = vmul.f32 %v4802_v33, %v5149_v56  ;;  %v1672_v56 = vld [vmem:[%s5691_s5 + $0x8] sm:$0xff] }
 0x5b9   :  { %4420 = vmatmul.mubr.msk.f32.vlgmr.msra.gmra.mrb[6].mxu1 %vm315_vm4, %v733_v30  ;;  %4807 = vrcp.f32 %v1411_v31  ;;  %v4675_v58 = vpack.c.bf16 %v1672_v56, %v1671_v55 }
 0x5ba   :  { %4428 = vmatpush3.msra.mxu1 %v901_v17  ;;  %4429 = vmatprep.mubr.msk.f32.mxu1 %vm4864_vm3, %v4863_v47  ;;  %v4804_v35 = vpop.eup %4803 }
 0x5bb   :  { %4437 = vmatprep.subr.mxu1 %v4863_v47  ;;  %v1081_v36 = vmul.f32 %v4804_v35, %v4788_v5  ;;  %v1581_v43 = vpop.permute.xlu1 %1580  ;;  %4676 = vmatprep.subr.bf16.mxu0 %v4675_v58 }
 0x5bc   :  { %4678 = vmatpush3.bf16.msra.mxu0 %v4675_v58 }
 0x5bd   :  { %4430 = vmatmul.mubr.msk.f32.vlgmr.msra.gmra.mrb[8].mxu1 %vm315_vm4, %v899_v34  ;;  %4680 = vmatprep.subr.bf16.mxu0 %v4679_v63 }
 0x5be   :  { %4438 = vmatpush3.msra.mxu1 %v1083_v18  ;;  %4439 = vmatprep.mubr.msk.f32.mxu1 %vm4864_vm3, %v4863_v47 }
 0x5bf   :  { %v1577_v37 = vpop.xlane.xlu0 %1576  ;;  %4447 = vmatprep.subr.mxu1 %v4863_v47 }
 0x5c0   :  { %4809 = vrcp.f32 %v1577_v37  ;;  %4682 = vmatpush3.bf16.msra.mxu0 %v4679_v63  ;;  %v1810_v37 = vld [vmem:[%s5632_s11 + $0x8] sm:$0xff]  ;;  %v4151_v63 = vld [vmem:[%s5634_s9] ss:$0 sm:$0xff] }
 0x5c1   :  { %4440 = vmatmul.mubr.msk.f32.vlgmr.msra.gmra.mrb[10].mxu1 %vm315_vm4, %v1081_v36 }
 0x5c2   :  { %v4806_v38 = vpop.eup %4805  ;;  %4448 = vmatpush3.msra.mxu1 %v1249_v28  ;;  %4449 = vmatprep.mubr.msk.f32.mxu1 %vm4864_vm3, %v4863_v47 }
 0x5c3   :  { %v1247_v39 = vmul.f32 %v4806_v38, %v4792_v12  ;;  %v1415_v40 = vpop.permute.xlu0 %1414  ;;  %4457 = vmatprep.subr.mxu1 %v4863_v47  ;;  %v4808_v41 = vpop.eup %4807 }
 0x5c4   :  { %v1413_v42 = vmul.f32 %v4808_v41, %v5160_v8 }
 0x5c5   :  { %4450 = vmatmul.mubr.msk.f32.vlgmr.msra.gmra.mrb[12].mxu1 %vm315_vm4, %v1247_v39  ;;  %v1811_v39 = vld [vmem:[%s5632_s11 + $0x10] sm:$0xff] }
 0x5c6   :  { %4458 = vmatpush3.msra.mxu1 %v1415_v40  ;;  %4459 = vmatprep.mubr.msk.f32.mxu1 %vm4864_vm3, %v4863_v47  ;;  %v1812_v40 = vld [vmem:[%s5632_s11 + $0x18] sm:$0xff] }
 0x5c7   :  { %4467 = vmatprep.subr.mxu1 %v4863_v47  ;;  %v4687_v41 = vpack.c.bf16 %v1812_v40, %v1811_v39 }
 0x5c9   :  { %4460 = vmatmul.mubr.msk.f32.vlgmr.msra.gmra.mrb[14].mxu1 %vm315_vm4, %v1413_v42  ;;  %v1903_v42 = vld [vmem:[%s5633_s13] sm:$0xff] }
 0x5ca   :  { %v4810_v45 = vpop.eup %4809  ;;  %4468 = vmatpush3.msra.mxu1 %v1581_v43  ;;  %4469 = vmatprep.mubr.msk.f32.mxu1 %vm4864_vm3, %v4863_v47  ;;  %v1904_v43 = vld [vmem:[%s5633_s13 + $0x8] sm:$0xff] }
 0x5cb   :  { %v1579_v48 = vmul.f32 %v4810_v45, %v5165_v14  ;;  %v1905_v45 = vld [vmem:[%s5633_s13 + $0x10] sm:$0xff] }
 0x5cd   :  { %4470 = vmatmul.mubr.msk.f32.vlgmr.msra.gmra.mrb[16].mxu1 %vm315_vm4, %v1579_v48  ;;  %v4691_v48 = vpack.c.bf16 %v1904_v43, %v1903_v42 }
 0x5cf   :  { %4692 = vmatprep.subr.bf16.mxu0 %v4691_v48 }
 0x657   :  { %v474_v49 = vpop.f32.mrb[2].mxu1 }
 0x658   :  { %v4401_v50 = vpop.f32.mrb[3].mxu1 }
 0x65b   :  { %v640_v53 = vpop.f32.mrb[4].mxu1 }
 0x65c   :  { %977 = vrot.lane.b32.xlu0 %v640_v53, %s5674_s3  ;;  %v4411_v54 = vpop.f32.mrb[5].mxu1  ;;  %v1907_v53 = vld [vmem:[%s5633_s13 + $0x20] sm:$0xff] }
 0x65d   :  { %v1908_v54 = vld [vmem:[%s5633_s13 + $0x28] sm:$0xff] }
 0x65e   :  { %v4699_v55 = vpack.c.bf16 %v1908_v54, %v1907_v53 }
 0x68c   :  { %v806_v57 = vpop.f32.mrb[6].mxu1 }
 0x68d   :  { %981 = vrot.lane.b32.xlu1 %v806_v57, %s5672_s7  ;;  %v4421_v59 = vpop.f32.mrb[7].mxu1 }
 0x690   :  { %v972_v62 = vpop.f32.mrb[8].mxu1 }
 0x691   :  { %985 = vrot.lane.b32.xlu1 %v972_v62, %s5670_s28  ;;  %v4431_v0 = vpop.f32.mrb[9].mxu1 }
 0x694   :  { %v1154_v1 = vpop.f32.mrb[10].mxu1 }
 0x695   :  { %v4441_v2 = vpop.f32.mrb[11].mxu1 }
 0x698   :  { %v1320_v3 = vpop.f32.mrb[12].mxu1 }
 0x699   :  { %1657 = vrot.lane.b32.xlu0 %v1320_v3, %s5674_s3  ;;  %v4451_v4 = vpop.f32.mrb[13].mxu1  ;;  %s5701_s3 = smov 8  }
 0x69c   :  { %v1486_v51 = vpop.f32.mrb[14].mxu1 }
 0x69d   :  { %1661 = vrot.lane.b32.xlu0 %v1486_v51, %s5672_s7  ;;  %v4461_v5 = vpop.f32.mrb[15].mxu1  ;;  %s5700_s7 = smov 56  }
 0x6a0   :  { %v1652_v6 = vpop.f32.mrb[16].mxu1 }
 0x6a1   :  { %1665 = vrot.lane.b32.xlu1 %v1652_v6, %s5670_s28  ;;  %v4471_v7 = vpop.f32.mrb[17].mxu1  ;;  %s5693_s28 = smov 112  }
 0x6a2   :  { %v1909_v7 = vld [vmem:[%s5633_s13 + $0x30] sm:$0xff] }
 0x6ce   :  { %v978_v8 = vpop.permute.xlu0 %977 }
 0x6cf   :  { %v988_v10 = vsel %vm315_vm4, %v474_v49, %v978_v8  ;;  %v1906_v49 = vld [vmem:[%s5633_s13 + $0x18] sm:$0xff] }
 0x6d0   :  { %v4695_v50 = vpack.c.bf16 %v1906_v49, %v1905_v45  ;;  %v1910_v8 = vld [vmem:[%s5633_s13 + $0x38] sm:$0xff]  ;;  %v4159_v49 = vld [vmem:[%s5638_s15] ss:$0 sm:$0xff] }
 0x6ff   :  { %v982_v9 = vpop.permute.xlu1 %981 }
 0x700   :  { %v990_v11 = vsel %vm989_vm5, %v988_v10, %v982_v9  ;;  %v4703_v9 = vpack.c.bf16 %v1910_v8, %v1909_v7  ;;  %v4153_v10 = vld [vmem:[%s5636_s12] ss:$0 sm:$0xff] }
 0x703   :  { %v986_v12 = vpop.permute.xlu1 %985 }
 0x704   :  { %v992_v13 = vsel %vm991_vm6, %v990_v11, %v986_v12 }
 0x705   :  { %4480 = vmatprep.mubr.msk.f32.mxu0 %vm176_vm2, %v992_v13 }
 0x70b   :  { %v1658_v14 = vpop.permute.xlu0 %1657 }
 0x70c   :  { %v1668_v16 = vsel %vm315_vm4, %v1154_v1, %v1658_v14  ;;  %v4152_v1 = vld [vmem:[%s5635_s10] ss:$0 sm:$0xff] }
 0x70f   :  { %v1662_v15 = vpop.permute.xlu0 %1661 }
 0x710   :  { %v1669_v17 = vsel %vm989_vm5, %v1668_v16, %v1662_v15 }
 0x713   :  { %v1666_v18 = vpop.permute.xlu1 %1665 }
 0x714   :  { %v1670_v19 = vsel %vm991_vm6, %v1669_v17, %v1666_v18  ;;  %v4156_v17 = vld [vmem:[%s5637_s14] ss:$0 sm:$0xff] }
 0x715   :  { %4481 = vmatmul.mubr.msk.f32.vlgmr.msra.gmra.mrb[18].mxu0 %vm176_vm2, %v1670_v19 }
 0x716   :  { %4694 = vmatpush3.bf16.msra.mxu0 %v4691_v48 }
 0x717   :  { %4696 = vmatprep.subr.bf16.mxu0 %v4695_v50 }
 0x71a   :  { %4698 = vmatpush3.bf16.msra.mxu0 %v4695_v50 }
 0x71b   :  { %4700 = vmatprep.subr.bf16.mxu0 %v4699_v55 }
 0x71e   :  { %4702 = vmatpush3.bf16.msra.mxu0 %v4699_v55  ;;  %v4160_v55 = vld [vmem:[%s5639_s16] ss:$0 sm:$0xff] }
 0x71f   :  { %4704 = vmatprep.subr.bf16.mxu0 %v4703_v9 }
 0x722   :  { %4706 = vmatpush3.bf16.msra.mxu0 %v4703_v9 }
 0x723   :  { %4534 = vmatprep.subr.mxu0 %v4863_v47 }
 0x7e8   :  { %v4482_v21 = vpop.f32.mrb[18].mxu0 }
 0x7e9   :  { %v1760_v22 = vadd.f32 %v4482_v21, %v4148_v20  ;;  %v1754_v23 = vpop.f32.mrb[19].mxu0 }
 0x7ea   :  { %v1755_v24 = vadd.f32 %v4148_v20, %v1754_v23 }
 0x7eb   :  { %v1764_v25 = vadd.f32 %v1760_v22, %v5043_v46 }
 0x7ec   :  { %v1763_v52 = vadd.f32 %v1755_v24, %v5039_v44  ;;  %v1809_v44 = vld [vmem:[%s5632_s11] sm:$0xff] }
 0x7ed   :  { %v1770_v26 = vsel %vm176_vm2, %v1764_v25, 0.0  ;;  %v4683_v38 = vpack.c.bf16 %v1810_v37, %v1809_v44  ;;  %v4163_v44 = vld [vmem:[%s5687_s24 + $0x30] sm:$0xff]  ;;  %v4164_v37 = vld [vmem:[%s5687_s24 + $0x38] sm:$0xff] }
 0x7ee   :  { %1771 = vadd.xlane.f32.xlu1 %v1770_v26  ;;  %v1767_v27 = vsel %vm176_vm2, %v1763_v52, 0.0 }
 0x7ef   :  { %1768 = vadd.xlane.f32.xlu0 %v1767_v27  ;;  %4684 = vmatprep.subr.bf16.mxu1 %v4683_v38 }
 0x7f0   :  { %4686 = vmatpush3.bf16.msra.mxu1 %v4683_v38  ;;  %v4711_v38 = vpack.c.bf16 %v4164_v37, %v4163_v44 }
 0x7f1   :  { %4688 = vmatprep.subr.bf16.mxu1 %v4687_v41 }
 0x7f4   :  { %4690 = vmatpush3.bf16.msra.mxu1 %v4687_v41 }
 0x87b   :  { %v1772_v28 = vpop.xlane.xlu1 %1771 }
 0x87c   :  { %v1774_v29 = vmul.f32 0.03125, %v1772_v28  ;;  %v1769_v30 = vpop.xlane.xlu0 %1768 }
 0x87d   :  { %v1773_v31 = vmul.f32 0.03125, %v1769_v30 }
 0x87e   :  { %v1776_v32 = vsub.f32 %v1764_v25, %v1774_v29 }
 0x87f   :  { %v1775_v33 = vsub.f32 %v1763_v52, %v1773_v31 }
 0x880   :  { %v1778_v36 = vmul.f32 %v1776_v32, %v1776_v32 }
 0x881   :  { %v1777_v34 = vmul.f32 %v1775_v33, %v1775_v33 }
 0x882   :  { %v1782_v46 = vsel %vm176_vm2, %v1778_v36, 0.0  ;;  %v4162_v36 = vld [vmem:[%s5687_s24 + $0x28] sm:$0xff] }
 0x883   :  { %v1779_v35 = vsel %vm176_vm2, %v1777_v34, 0.0 }
 0x884   :  { %1780 = vadd.xlane.f32.xlu0 %v1779_v35  ;;  %v4161_v35 = vld [vmem:[%s5687_s24 + $0x20] sm:$0xff] }
 0x888   :  { %1783 = vadd.xlane.f32.xlu0 %v1782_v46  ;;  %v4707_v46 = vpack.c.bf16 %v4162_v36, %v4161_v35 }
 0x88a   :  { %4708 = vmatprep.subr.bf16.mxu1 %v4707_v46 }
 0x911   :  { %v1781_v56 = vpop.xlane.xlu0 %1780 }
 0x912   :  { %v1785_v57 = vmul.f32 0.03125, %v1781_v56 }
 0x914   :  { %v1787_v58 = vadd.f32 1e-05, %v1785_v57 }
 0x915   :  { %v1784_v59 = vpop.xlane.xlu0 %1783 }
 0x916   :  { %4811 = vrsqrt.f32 %v1787_v58  ;;  %v1786_v60 = vmul.f32 0.03125, %v1784_v59 }
 0x918   :  { %v1788_v61 = vadd.f32 1e-05, %v1786_v60  ;;  %v4166_v60 = vld [vmem:[%s5690_s25 + $0x1] ss:$0 sm:$0xff]  ;;  %s5695_s25 = smov 104  }
 0x91a   :  { %4813 = vrsqrt.f32 %v1788_v61 }
 0x920   :  { %v4812_v62 = vpop.eup %4811 }
 0x921   :  { %v1791_v0 = vmul.f32 %v4812_v62, %v1775_v33 }
 0x923   :  { %v1799_v2 = vmul.f32 %v4151_v63, %v1791_v0 }
 0x924   :  { %v4814_v3 = vpop.eup %4813 }
 0x925   :  { %v1792_v4 = vmul.f32 %v4814_v3, %v1776_v32  ;;  %v1807_v51 = vadd.f32 %v4152_v1, %v1799_v2 }
 0x927   :  { %v1800_v5 = vmul.f32 %v4151_v63, %v1792_v4  ;;  %4491 = vmatprep.mubr.msk.f32.mxu1 %vm176_vm2, %v1807_v51 }
 0x929   :  { %v1808_v6 = vadd.f32 %v4152_v1, %v1800_v5 }
 0x92b   :  { %4492 = vmatmul.mubr.msk.f32.vlgmr.msra.gmra.mrb[18].mxu1 %vm176_vm2, %v1808_v6 }
 0x92c   :  { %4710 = vmatpush3.bf16.msra.mxu1 %v4707_v46 }
 0x92d   :  { %4712 = vmatprep.subr.bf16.mxu1 %v4711_v38 }
 0x930   :  { %4714 = vmatpush3.bf16.msra.mxu1 %v4711_v38 }
 0x931   :  { %4524 = vmatprep.subr.mxu1 %v4863_v47 }
 0x9fe   :  { %v4493_v11 = vpop.f32.mrb[18].mxu1 }
 0x9ff   :  { %v1898_v12 = vadd.f32 %v4493_v11, %v4153_v10  ;;  %v1892_v13 = vpop.f32.mrb[19].mxu1 }
 0xa00   :  { %v1893_v14 = vadd.f32 %v4153_v10, %v1892_v13 }
 0xa01   :  { %v1902_v16 = vmax.f32 %v1898_v12, 0.0 }
 0xa02   :  { %v1901_v15 = vmax.f32 %v1893_v14, 0.0 }
 0xa04   :  { %4510 = vmatprep.mubr.msk.f32.mxu0 %vm1918_vm7, %v1901_v15 }
 0xa05   :  { %4511 = vmatmul.mubr.msk.f32.vlgmr.msra.gmra.mrb[20].mxu0 %vm1918_vm7, %v1902_v16 }
 0xa06   :  { %4536 = vmatprep.mubr.msk.f32.mxu0 %vm4864_vm3, %v4863_v47 }
 0xad8   :  { %v4512_v18 = vpop.f32.mrb[20].mxu0 }
 0xad9   :  { %v1997_v19 = vadd.f32 %v4512_v18, %v4156_v17  ;;  %v1991_v20 = vpop.f32.mrb[21].mxu0 }
 0xada   :  { %v1992_v21 = vadd.f32 %v4156_v17, %v1991_v20 }
 0xadb   :  { %v2001_v22 = vadd.f32 %v1997_v19, %v1808_v6 }
 0xadc   :  { %v2000_v23 = vadd.f32 %v1992_v21, %v1807_v51 }
 0xadd   :  { %v2007_v24 = vsel %vm176_vm2, %v2001_v22, 0.0 }
 0xade   :  { %2008 = vadd.xlane.f32.xlu1 %v2007_v24  ;;  %v2004_v25 = vsel %vm176_vm2, %v2000_v23, 0.0 }
 0xadf   :  { %2005 = vadd.xlane.f32.xlu0 %v2004_v25 }
 0xb6b   :  { %v2009_v52 = vpop.xlane.xlu1 %2008 }
 0xb6c   :  { %v2011_v26 = vmul.f32 0.03125, %v2009_v52  ;;  %v2006_v27 = vpop.xlane.xlu0 %2005 }
 0xb6d   :  { %v2010_v28 = vmul.f32 0.03125, %v2006_v27 }
 0xb6e   :  { %v2013_v29 = vsub.f32 %v2001_v22, %v2011_v26 }
 0xb6f   :  { %v2012_v30 = vsub.f32 %v2000_v23, %v2010_v28 }
 0xb70   :  { %v2015_v31 = vmul.f32 %v2013_v29, %v2013_v29 }
 0xb71   :  { %v2014_v32 = vmul.f32 %v2012_v30, %v2012_v30 }
 0xb72   :  { %v2019_v33 = vsel %vm176_vm2, %v2015_v31, 0.0 }
 0xb73   :  { %2020 = vadd.xlane.f32.xlu1 %v2019_v33  ;;  %v2016_v34 = vsel %vm176_vm2, %v2014_v32, 0.0 }
 0xb74   :  { %2017 = vadd.xlane.f32.xlu0 %v2016_v34 }
 0xc00   :  { %v2021_v39 = vpop.xlane.xlu1 %2020 }
 0xc01   :  { %v2023_v40 = vmul.f32 0.03125, %v2021_v39  ;;  %v2018_v41 = vpop.xlane.xlu0 %2017 }
 0xc02   :  { %v2022_v42 = vmul.f32 0.03125, %v2018_v41 }
 0xc03   :  { %v2025_v43 = vadd.f32 1e-05, %v2023_v40 }
 0xc04   :  { %v2024_v45 = vadd.f32 1e-05, %v2022_v42 }
 0xc05   :  { %4815 = vrsqrt.f32 %v2025_v43 }
 0xc06   :  { %4817 = vrsqrt.f32 %v2024_v45 }
 0xc0f   :  { %v4816_v48 = vpop.eup %4815 }
 0xc10   :  { %v4818_v50 = vpop.eup %4817  ;;  %v2029_v53 = vmul.f32 %v4816_v48, %v2013_v29 }
 0xc11   :  { %v2028_v54 = vmul.f32 %v4818_v50, %v2012_v30 }
 0xc12   :  { %v2037_v56 = vmul.f32 %v4159_v49, %v2029_v53 }
 0xc13   :  { %v2036_v57 = vmul.f32 %v4159_v49, %v2028_v54 }
 0xc14   :  { %v5319_v59 = vadd.f32 %v4160_v55, %v2037_v56 }
 0xc15   :  { %v5317_v58 = vadd.f32 %v4160_v55, %v2036_v57 }
 0xc17   :  { %4521 = vmatprep.mubr.msk.f32.mxu1 %vm176_vm2, %v5317_v58 }
 0xc18   :  { %4522 = vmatmul.mubr.msk.f32.vlgmr.msra.gmra.mrb[20].mxu1 %vm176_vm2, %v5319_v59 }
 0xc19   :  { %4526 = vmatprep.mubr.msk.f32.mxu1 %vm4864_vm3, %v4863_v47 }
 0xceb   :  { %v4523_v61 = vpop.f32.mrb[20].mxu1 }
 0xcec   :  { %v2131_v62 = vpop.f32.mrb[21].mxu1  ;;  %v5344_v0 = vadd.f32 %v4523_v61, %v4166_v60 }
 0xced   :  { %v5330_v63 = vadd.f32 %v4166_v60, %v2131_v62 }
 0xcef   :  { %2307 = vrot.lane.b32.xlu1 %v5330_v63, %s4865_s4  ;;  %2141 = vrot.lane.b32.xlu0 %v5330_v63, %s4866_s0 }
 0xcf3   :  { %2305 = vrot.lane.b32.xlu1 %v5330_v63, %s5692_s26  ;;  %2471 = vrot.lane.b32.xlu0 %v5330_v63, %s5693_s28 }
 0xcf7   :  { %2473 = vrot.lane.b32.xlu1 %v5330_v63, %s5694_s2  ;;  %2637 = vrot.lane.b32.xlu0 %v5330_v63, %s5695_s25 }
 0xcfb   :  { %2639 = vrot.lane.b32.xlu1 %v5330_v63, %s5696_s6  ;;  %2985 = vrot.lane.b32.xlu0 %v5344_v0, %s4865_s4  ;;  %s5697_s4 = smov 64  }
 0xcff   :  { %2819 = vrot.lane.b32.xlu1 %v5344_v0, %s4866_s0  ;;  %3151 = vrot.lane.b32.xlu0 %v5344_v0, %s5694_s2  ;;  %s5698_s0 = smov 48  }
 0xd03   :  { %2983 = vrot.lane.b32.xlu1 %v5344_v0, %s5692_s26  ;;  %3317 = vrot.lane.b32.xlu0 %v5344_v0, %s5696_s6  ;;  %s5702_s26 = smov 16  }
 0xd07   :  { %3149 = vrot.lane.b32.xlu1 %v5344_v0, %s5693_s28 }
 0xd0b   :  { %3315 = vrot.lane.b32.xlu1 %v5344_v0, %s5695_s25 }
 0xd61   :  { %v2308_v1 = vpop.permute.xlu1 %2307  ;;  %v2142_v2 = vpop.permute.xlu0 %2141 }
 0xd62   :  { %4525 = vmatpush3.xpose.msk.msra.mxu1 %vm315_vm4, %v2142_v2  ;;  %4535 = vmatpush3.xpose.msk.msra.mxu0 %vm315_vm4, %v2308_v1 }
 0xd63   :  { %4544 = vmatprep.subr.mxu0 %v4863_v47  ;;  %4529 = vmatprep.subr.mxu1 %v4863_v47 }
 0xd65   :  { %v2306_v3 = vpop.permute.xlu1 %2305  ;;  %4527 = vmatmul.mubr.msk.f32.vlgmr.msra.gmra.mrb[22].mxu1 %vm315_vm4, %v5330_v63  ;;  %v2472_v4 = vpop.permute.xlu0 %2471 }
 0xd66   :  { %4537 = vmatmul.mubr.msk.f32.vlgmr.msra.gmra.mrb[22].mxu0 %vm315_vm4, %v2306_v3  ;;  %4531 = vmatprep.mubr.msk.f32.mxu1 %vm4864_vm3, %v4863_v47 }
 0xd67   :  { %4546 = vmatprep.mubr.msk.f32.mxu0 %vm4864_vm3, %v4863_v47 }
 0xd69   :  { %v2474_v51 = vpop.permute.xlu1 %2473  ;;  %v2638_v5 = vpop.permute.xlu0 %2637 }
 0xd6a   :  { %4545 = vmatpush3.xpose.msk.msra.mxu0 %vm315_vm4, %v2474_v51 }
 0xd6b   :  { %4554 = vmatprep.subr.mxu0 %v4863_v47 }
 0xd6d   :  { %v2640_v6 = vpop.permute.xlu1 %2639  ;;  %4547 = vmatmul.mubr.msk.f32.vlgmr.msra.gmra.mrb[24].mxu0 %vm315_vm4, %v2472_v4  ;;  %v2986_v7 = vpop.permute.xlu0 %2985 }
 0xd6e   :  { %4555 = vmatpush3.xpose.msk.msra.mxu0 %vm315_vm4, %v2640_v6  ;;  %4556 = vmatprep.mubr.msk.f32.mxu0 %vm4864_vm3, %v4863_v47 }
 0xd6f   :  { %4564 = vmatprep.subr.mxu0 %v4863_v47 }
 0xd71   :  { %v2820_v8 = vpop.permute.xlu1 %2819  ;;  %4557 = vmatmul.mubr.msk.f32.vlgmr.msra.gmra.mrb[26].mxu0 %vm315_vm4, %v2638_v5  ;;  %v3152_v10 = vpop.permute.xlu0 %3151 }
 0xd72   :  { %4565 = vmatpush3.xpose.msk.msra.mxu0 %vm315_vm4, %v2820_v8  ;;  %4566 = vmatprep.mubr.msk.f32.mxu0 %vm4864_vm3, %v4863_v47 }
 0xd73   :  { %4574 = vmatprep.subr.mxu0 %v4863_v47 }
 0xd75   :  { %v2984_v9 = vpop.permute.xlu1 %2983  ;;  %4567 = vmatmul.mubr.msk.f32.vlgmr.msra.gmra.mrb[28].mxu0 %vm315_vm4, %v5344_v0  ;;  %v3318_v12 = vpop.permute.xlu0 %3317 }
 0xd76   :  { %4575 = vmatpush3.xpose.msk.msra.mxu0 %vm315_vm4, %v2986_v7  ;;  %4576 = vmatprep.mubr.msk.f32.mxu0 %vm4864_vm3, %v4863_v47 }
 0xd77   :  { %4584 = vmatprep.subr.mxu0 %v4863_v47 }
 0xd79   :  { %4577 = vmatmul.mubr.msk.f32.vlgmr.msra.gmra.mrb[30].mxu0 %vm315_vm4, %v2984_v9  ;;  %v3150_v11 = vpop.permute.xlu1 %3149 }
 0xd7a   :  { %4585 = vmatpush3.xpose.msk.msra.mxu0 %vm315_vm4, %v3152_v10  ;;  %4586 = vmatprep.mubr.msk.f32.mxu0 %vm4864_vm3, %v4863_v47 }
 0xd7b   :  { %4594 = vmatprep.subr.mxu0 %v4863_v47 }
 0xd7d   :  { %4587 = vmatmul.mubr.msk.f32.vlgmr.msra.gmra.mrb[32].mxu0 %vm315_vm4, %v3150_v11  ;;  %v3316_v13 = vpop.permute.xlu1 %3315 }
 0xd7e   :  { %4595 = vmatpush3.xpose.msk.msra.mxu0 %vm315_vm4, %v3318_v12  ;;  %4596 = vmatprep.mubr.msk.f32.mxu0 %vm4864_vm3, %v4863_v47 }
 0xd81   :  { %4597 = vmatmul.mubr.msk.f32.vlgmr.msra.gmra.mrb[34].mxu0 %vm315_vm4, %v3316_v13 }
 0xe38   :  { %v2213_v14 = vpop.f32.mrb[22].mxu1 }
 0xe39   :  { %v2217_v15 = vmul.f32 0.35355338, %v2213_v14  ;;  %v4528_v16 = vpop.f32.mrb[23].mxu1  ;;  %v2379_v17 = vpop.f32.mrb[22].mxu0 }
 0xe3a   :  { %v2383_v18 = vmul.f32 0.35355338, %v2379_v17  ;;  %v4538_v19 = vpop.f32.mrb[23].mxu0 }
 0xe3b   :  { %v2218_v20 = vsel %vm315_vm4, %v2217_v15, -inf }
 0xe3c   :  { %2219 = vmax.xlane.f32.xlu0 %v2218_v20  ;;  %v2384_v21 = vsel %vm315_vm4, %v2383_v18, -inf }
 0xe3d   :  { %2385 = vmax.xlane.f32.xlu1 %v2384_v21 }
 0xe40   :  { %v2545_v22 = vpop.f32.mrb[24].mxu0 }
 0xe41   :  { %v5403_v23 = vmul.f32 0.35355338, %v2545_v22  ;;  %v4548_v24 = vpop.f32.mrb[25].mxu0 }
 0xe43   :  { %v2550_v25 = vsel %vm315_vm4, %v5403_v23, -inf }
 0xe44   :  { %2551 = vmax.xlane.f32.xlu0 %v2550_v25  ;;  %v2711_v52 = vpop.f32.mrb[26].mxu0 }
 0xe45   :  { %v2715_v26 = vmul.f32 0.35355338, %v2711_v52  ;;  %v4558_v27 = vpop.f32.mrb[27].mxu0 }
 0xe47   :  { %v2716_v28 = vsel %vm315_vm4, %v2715_v26, -inf }
 0xe48   :  { %2717 = vmax.xlane.f32.xlu0 %v2716_v28  ;;  %v2891_v29 = vpop.f32.mrb[28].mxu0 }
 0xe49   :  { %v2895_v30 = vmul.f32 0.35355338, %v2891_v29  ;;  %v4568_v31 = vpop.f32.mrb[29].mxu0 }
 0xe4b   :  { %v2896_v32 = vsel %vm315_vm4, %v2895_v30, -inf }
 0xe4c   :  { %2897 = vmax.xlane.f32.xlu0 %v2896_v32  ;;  %v3057_v33 = vpop.f32.mrb[30].mxu0 }
 0xe4d   :  { %v3061_v34 = vmul.f32 0.35355338, %v3057_v33  ;;  %v4578_v35 = vpop.f32.mrb[31].mxu0 }
 0xe4f   :  { %v3062_v36 = vsel %vm315_vm4, %v3061_v34, -inf }
 0xe50   :  { %3063 = vmax.xlane.f32.xlu1 %v3062_v36  ;;  %v3223_v46 = vpop.f32.mrb[32].mxu0 }
 0xe51   :  { %v3227_v44 = vmul.f32 0.35355338, %v3223_v46  ;;  %v4588_v37 = vpop.f32.mrb[33].mxu0 }
 0xe53   :  { %v3228_v38 = vsel %vm315_vm4, %v3227_v44, -inf }
 0xe54   :  { %3229 = vmax.xlane.f32.xlu0 %v3228_v38  ;;  %v3389_v39 = vpop.f32.mrb[34].mxu0 }
 0xe55   :  { %v4598_v40 = vpop.f32.mrb[35].mxu0  ;;  %v3393_v41 = vmul.f32 0.35355338, %v3389_v39 }
 0xe57   :  { %v3394_v42 = vsel %vm315_vm4, %v3393_v41, -inf }
 0xe61   :  { %2229 = vrot.lane.b32.xlu1 %v5330_v63, %s5697_s4 }
 0xe85   :  { %3395 = vmax.xlane.f32.xlu1 %v3394_v42 }
 0xe96   :  { %2561 = vrot.lane.b32.xlu1 %v5330_v63, %s5698_s0 }
 0xe9a   :  { %2727 = vrot.lane.b32.xlu1 %v5330_v63, %s5699_s27 }
 0xe9e   :  { %2907 = vrot.lane.b32.xlu1 %v5344_v0, %s5697_s4  ;;  %s5703_s4 = smov 24  }
 0xec9   :  { %v2220_v43 = vpop.xlane.xlu0 %2219 }
 0xeca   :  { %v2221_v45 = vsub.f32 %v2217_v15, %v2220_v43  ;;  %v2386_v48 = vpop.xlane.xlu1 %2385 }
 0xecb   :  { %v2387_v49 = vsub.f32 %v2383_v18, %v2386_v48 }
 0xecc   :  { %v2222_v50 = vmul.f32 1.442695, %v2221_v45 }
 0xecd   :  { %v2388_v53 = vmul.f32 1.442695, %v2387_v49 }
 0xece   :  { %4819 = vpow2.f32 %v2222_v50 }
 0xecf   :  { %4821 = vpow2.f32 %v2388_v53 }
 0xed1   :  { %v2552_v54 = vpop.xlane.xlu0 %2551 }
 0xed2   :  { %v2553_v5 = vsub.f32 %v5403_v23, %v2552_v54 }
 0xed4   :  { %v2554_v7 = vmul.f32 1.442695, %v2553_v5 }
 0xed5   :  { %v2718_v55 = vpop.xlane.xlu0 %2717 }
 0xed6   :  { %v2719_v56 = vsub.f32 %v2715_v26, %v2718_v55 }
 0xed8   :  { %v4820_v57 = vpop.eup %4819  ;;  %v2720_v60 = vmul.f32 1.442695, %v2719_v56 }
 0xed9   :  { %v5420_v61 = vpop.eup %4821  ;;  %v2224_v62 = vsel %vm315_vm4, %v4820_v57, 0.0  ;;  %v2898_v6 = vpop.xlane.xlu0 %2897 }
 0xeda   :  { %4823 = vpow2.f32 %v2720_v60  ;;  %2225 = vadd.xlane.f32.xlu0 %v2224_v62  ;;  %v2390_v1 = vsel %vm315_vm4, %v5420_v61, 0.0  ;;  %v2899_v8 = vsub.f32 %v2895_v30, %v2898_v6  ;;  %v4195_v6 = vld [vmem:[%s5691_s5 + $0x30] sm:$0xff] }
 0xedb   :  { %2391 = vadd.xlane.f32.xlu1 %v2390_v1  ;;  %4825 = vpow2.f32 %v2554_v7  ;;  %v4196_v7 = vld [vmem:[%s5691_s5 + $0x38] sm:$0xff] }
 0xedc   :  { %v2900_v10 = vmul.f32 1.442695, %v2899_v8 }
 0xedd   :  { %v3064_v2 = vpop.xlane.xlu1 %3063 }
 0xede   :  { %4827 = vpow2.f32 %v2900_v10  ;;  %v3065_v12 = vsub.f32 %v3061_v34, %v3064_v2 }
 0xee0   :  { %v3066_v14 = vmul.f32 1.442695, %v3065_v12 }
 0xee1   :  { %v2230_v3 = vpop.permute.xlu1 %2229  ;;  %v3230_v9 = vpop.xlane.xlu0 %3229 }
 0xee2   :  { %4530 = vmatpush3.msra.mxu1 %v2230_v3  ;;  %v3231_v11 = vsub.f32 %v3227_v44, %v3230_v9  ;;  %v4193_v3 = vld [vmem:[%s5691_s5 + $0x20] sm:$0xff]  ;;  %v4719_v9 = vpack.c.bf16 %v4196_v7, %v4195_v6 }
 0xee3   :  { %4539 = vmatprep.subr.mxu1 %v4863_v47 }
 0xee4   :  { %v5426_v4 = vpop.eup %4823  ;;  %v3232_v13 = vmul.f32 1.442695, %v3231_v11 }
 0xee5   :  { %v2722_v51 = vsel %vm315_vm4, %v5426_v4, 0.0  ;;  %v4826_v15 = vpop.eup %4825 }
 0xee6   :  { %2723 = vadd.xlane.f32.xlu1 %v2722_v51  ;;  %4829 = vpow2.f32 %v3232_v13 }
 0xee7   :  { %4831 = vpow2.f32 %v3066_v14 }
 0xee8   :  { %v4828_v16 = vpop.eup %4827 }
 0xee9   :  { %v2902_v18 = vsel %vm315_vm4, %v4828_v16, 0.0 }
 0xef0   :  { %2395 = vrot.lane.b32.xlu0 %v5330_v63, %s5700_s7  ;;  %v2556_v63 = vsel %vm315_vm4, %v4826_v15, 0.0  ;;  %v5437_v19 = vpop.eup %4829 }
 0xef1   :  { %v3234_v22 = vsel %vm315_vm4, %v5437_v19, 0.0  ;;  %v4832_v23 = vpop.eup %4831 }
 0xef2   :  { %v3068_v24 = vsel %vm315_vm4, %v4832_v23, 0.0 }
 0xef7   :  { %3073 = vrot.lane.b32.xlu1 %v5344_v0, %s5700_s7 }
 0xf0f   :  { %2557 = vadd.xlane.f32.xlu0 %v2556_v63 }
 0xf12   :  { %v3396_v17 = vpop.xlane.xlu1 %3395 }
 0xf13   :  { %v3397_v20 = vsub.f32 %v3393_v41, %v3396_v17  ;;  %2903 = vadd.xlane.f32.xlu0 %v2902_v18 }
 0xf15   :  { %v3398_v21 = vmul.f32 1.442695, %v3397_v20 }
 0xf16   :  { %v2562_v26 = vpop.permute.xlu1 %2561 }
 0xf17   :  { %4833 = vpow2.f32 %v3398_v21  ;;  %3235 = vadd.xlane.f32.xlu0 %v3234_v22 }
 0xf1a   :  { %v2728_v27 = vpop.permute.xlu1 %2727 }
 0xf1b   :  { %3069 = vadd.xlane.f32.xlu1 %v3068_v24 }
 0xf1e   :  { %v2908_v28 = vpop.permute.xlu1 %2907 }
 0xf21   :  { %v5442_v25 = vpop.eup %4833 }
 0xf22   :  { %v3400_v52 = vsel %vm315_vm4, %v5442_v25, 0.0 }
 0xf23   :  { %3401 = vadd.xlane.f32.xlu0 %v3400_v52 }
 0xf2c   :  { %3405 = vrot.lane.b32.xlu1 %v5344_v0, %s5699_s27 }
 0xf39   :  { %3239 = vrot.lane.b32.xlu0 %v5344_v0, %s5698_s0 }
 0xf67   :  { %v2226_v29 = vpop.xlane.xlu0 %2225 }
 0xf68   :  { %4835 = vrcp.f32 %v2226_v29  ;;  %v2392_v30 = vpop.xlane.xlu1 %2391  ;;  %v4198_v29 = vld [vmem:[%s5631_s8 + $0x1] ss:$0 sm:$0xff] }
 0xf69   :  { %4837 = vrcp.f32 %v2392_v30 }
 0xf6b   :  { %v2396_v34 = vpop.permute.xlu0 %2395 }
 0xf72   :  { %v4836_v31 = vpop.eup %4835 }
 0xf73   :  { %v2228_v32 = vmul.f32 %v4836_v31, %v4820_v57  ;;  %v4838_v33 = vpop.eup %4837  ;;  %v2724_v0 = vpop.xlane.xlu1 %2723 }
 0xf74   :  { %v2394_v35 = vmul.f32 %v4838_v33, %v5420_v61 }
 0xf75   :  { %4532 = vmatmul.mubr.msk.f32.vlgmr.msra.gmra.mrb[24].mxu1 %vm315_vm4, %v2228_v32 }
 0xf76   :  { %4540 = vmatpush3.msra.mxu1 %v2396_v34  ;;  %4541 = vmatprep.mubr.msk.f32.mxu1 %vm4864_vm3, %v4863_v47 }
 0xf77   :  { %4549 = vmatprep.subr.mxu1 %v4863_v47  ;;  %v3074_v44 = vpop.permute.xlu1 %3073 }
 0xf79   :  { %4542 = vmatmul.mubr.msk.f32.vlgmr.msra.gmra.mrb[26].mxu1 %vm315_vm4, %v2394_v35 }
 0xf7a   :  { %4550 = vmatpush3.msra.mxu1 %v2562_v26  ;;  %4551 = vmatprep.mubr.msk.f32.mxu1 %vm4864_vm3, %v4863_v47 }
 0xf7b   :  { %4559 = vmatprep.subr.mxu1 %v4863_v47 }
 0xf9c   :  { %v2558_v36 = vpop.xlane.xlu0 %2557 }
 0xf9d   :  { %4839 = vrcp.f32 %v2558_v36 }
 0xf9e   :  { %4841 = vrcp.f32 %v2724_v0 }
 0xfa0   :  { %v2904_v46 = vpop.xlane.xlu0 %2903 }
 0xfa1   :  { %4843 = vrcp.f32 %v2904_v46 }
 0xfa4   :  { %v3236_v39 = vpop.xlane.xlu0 %3235 }
 0xfa7   :  { %v4840_v37 = vpop.eup %4839 }
 0xfa8   :  { %v2560_v38 = vmul.f32 %v4840_v37, %v4826_v15  ;;  %v3070_v40 = vpop.xlane.xlu1 %3069  ;;  %v4842_v41 = vpop.eup %4841 }
 0xfa9   :  { %4845 = vrcp.f32 %v3070_v40  ;;  %v2726_v42 = vmul.f32 %v4842_v41, %v5426_v4  ;;  %v4194_v4 = vld [vmem:[%s5691_s5 + $0x28] sm:$0xff] }
 0xfaa   :  { %4552 = vmatmul.mubr.msk.f32.vlgmr.msra.gmra.mrb[28].mxu1 %vm315_vm4, %v2560_v38  ;;  %4847 = vrcp.f32 %v3236_v39 }
 0xfab   :  { %4560 = vmatpush3.msra.mxu1 %v2728_v27  ;;  %4561 = vmatprep.mubr.msk.f32.mxu1 %vm4864_vm3, %v4863_v47  ;;  %v4844_v43 = vpop.eup %4843 }
 0xfac   :  { %4569 = vmatprep.subr.mxu1 %v4863_v47  ;;  %v2906_v45 = vmul.f32 %v4844_v43, %v4828_v16  ;;  %v3406_v56 = vpop.permute.xlu1 %3405 }
 0xfae   :  { %4562 = vmatmul.mubr.msk.f32.vlgmr.msra.gmra.mrb[30].mxu1 %vm315_vm4, %v2726_v42 }
 0xfaf   :  { %4570 = vmatpush3.msra.mxu1 %v2908_v28  ;;  %4571 = vmatprep.mubr.msk.f32.mxu1 %vm4864_vm3, %v4863_v47 }
 0xfb0   :  { %v3402_v48 = vpop.xlane.xlu0 %3401  ;;  %4579 = vmatprep.subr.mxu1 %v4863_v47 }
 0xfb1   :  { %4849 = vrcp.f32 %v3402_v48 }
 0xfb2   :  { %4572 = vmatmul.mubr.msk.f32.vlgmr.msra.gmra.mrb[32].mxu1 %vm315_vm4, %v2906_v45  ;;  %v4206_v45 = vld [vmem:[%s5632_s11 + $0x28] sm:$0xff] }
 0xfb3   :  { %v4846_v49 = vpop.eup %4845  ;;  %4580 = vmatpush3.msra.mxu1 %v3074_v44  ;;  %4581 = vmatprep.mubr.msk.f32.mxu1 %vm4864_vm3, %v4863_v47 }
 0xfb4   :  { %v3072_v50 = vmul.f32 %v4846_v49, %v4832_v23  ;;  %v3240_v53 = vpop.permute.xlu0 %3239  ;;  %4589 = vmatprep.subr.mxu1 %v4863_v47  ;;  %v4848_v54 = vpop.eup %4847  ;;  %v4207_v49 = vld [vmem:[%s5632_s11 + $0x30] sm:$0xff] }
 0xfb5   :  { %v3238_v55 = vmul.f32 %v4848_v54, %v5437_v19  ;;  %v4213_v54 = vld [vmem:[%s5633_s13 + $0x40] sm:$0xff] }
 0xfb6   :  { %4582 = vmatmul.mubr.msk.f32.vlgmr.msra.gmra.mrb[34].mxu1 %vm315_vm4, %v3072_v50  ;;  %v4208_v50 = vld [vmem:[%s5632_s11 + $0x38] sm:$0xff] }
 0xfb7   :  { %4590 = vmatpush3.msra.mxu1 %v3240_v53  ;;  %4591 = vmatprep.mubr.msk.f32.mxu1 %vm4864_vm3, %v4863_v47  ;;  %v4727_v53 = vpack.c.bf16 %v4208_v50, %v4207_v49  ;;  %v4227_v49 = vld [vmem:[%s5638_s15 + $0x1] ss:$0 sm:$0xff] }
 0xfb8   :  { %4599 = vmatprep.subr.mxu1 %v4863_v47 }
 0xfba   :  { %4592 = vmatmul.mubr.msk.f32.vlgmr.msra.gmra.mrb[36].mxu1 %vm315_vm4, %v3238_v55  ;;  %v4214_v55 = vld [vmem:[%s5633_s13 + $0x48] sm:$0xff] }
 0xfbb   :  { %v4850_v57 = vpop.eup %4849  ;;  %4600 = vmatpush3.msra.mxu1 %v3406_v56  ;;  %4601 = vmatprep.mubr.msk.f32.mxu1 %vm4864_vm3, %v4863_v47  ;;  %v4715_v47 = vpack.c.bf16 %v4194_v4, %v4193_v3  ;;  %v4215_v56 = vld [vmem:[%s5633_s13 + $0x50] sm:$0xff] }
 0xfbc   :  { %v3404_v60 = vmul.f32 %v4850_v57, %v5442_v25  ;;  %v4731_v57 = vpack.c.bf16 %v4214_v55, %v4213_v54  ;;  %v4228_v54 = vld [vmem:[%s5639_s16 + $0x1] ss:$0 sm:$0xff] }
 0xfbd   :  { %4716 = vmatprep.subr.bf16.mxu0 %v4715_v47 }
 0xfbe   :  { %4602 = vmatmul.mubr.msk.f32.vlgmr.msra.gmra.mrb[38].mxu1 %vm315_vm4, %v3404_v60  ;;  %4718 = vmatpush3.bf16.msra.mxu0 %v4715_v47  ;;  %v4216_v60 = vld [vmem:[%s5633_s13 + $0x58] sm:$0xff] }
 0xfbf   :  { %4720 = vmatprep.subr.bf16.mxu0 %v4719_v9 }
 0xfc2   :  { %4722 = vmatpush3.bf16.msra.mxu0 %v4719_v9 }
 0xfc3   :  { %4732 = vmatprep.subr.bf16.mxu0 %v4731_v57 }
0x1048   :  { %v2301_v61 = vpop.f32.mrb[24].mxu1 }
0x1049   :  { %v4533_v62 = vpop.f32.mrb[25].mxu1 }
0x104a   :  { %v4217_v62 = vld [vmem:[%s5633_s13 + $0x60] sm:$0xff] }
0x104c   :  { %v2467_v1 = vpop.f32.mrb[26].mxu1 }
0x104d   :  { %2804 = vrot.lane.b32.xlu0 %v2467_v1, %s5701_s3  ;;  %v4543_v2 = vpop.f32.mrb[27].mxu1  ;;  %v4218_v1 = vld [vmem:[%s5633_s13 + $0x68] sm:$0xff] }
0x104e   :  { %v4739_v2 = vpack.c.bf16 %v4218_v1, %v4217_v62 }
0x107d   :  { %v2633_v51 = vpop.f32.mrb[28].mxu1 }
0x107e   :  { %2808 = vrot.lane.b32.xlu1 %v2633_v51, %s5702_s26  ;;  %v4553_v5 = vpop.f32.mrb[29].mxu1 }
0x1081   :  { %v2799_v8 = vpop.f32.mrb[30].mxu1 }
0x1082   :  { %2812 = vrot.lane.b32.xlu1 %v2799_v8, %s5703_s4  ;;  %v4563_v10 = vpop.f32.mrb[31].mxu1  ;;  %v4203_v8 = vld [vmem:[%s5634_s9 + $0x1] ss:$0 sm:$0xff] }
0x1083   :  { %v4204_v10 = vld [vmem:[%s5635_s10 + $0x1] ss:$0 sm:$0xff] }
0x1085   :  { %v2979_v11 = vpop.f32.mrb[32].mxu1 }
0x1086   :  { %v4573_v12 = vpop.f32.mrb[33].mxu1 }
0x1089   :  { %v3145_v13 = vpop.f32.mrb[34].mxu1 }
0x108a   :  { %3482 = vrot.lane.b32.xlu0 %v3145_v13, %s5701_s3  ;;  %v4583_v14 = vpop.f32.mrb[35].mxu1 }
0x108d   :  { %v3311_v15 = vpop.f32.mrb[36].mxu1 }
0x108e   :  { %3486 = vrot.lane.b32.xlu0 %v3311_v15, %s5702_s26  ;;  %v4593_v63 = vpop.f32.mrb[37].mxu1 }
0x1091   :  { %v3477_v16 = vpop.f32.mrb[38].mxu1 }
0x1092   :  { %3490 = vrot.lane.b32.xlu1 %v3477_v16, %s5703_s4  ;;  %v4603_v17 = vpop.f32.mrb[39].mxu1  ;;  %v4219_v16 = vld [vmem:[%s5633_s13 + $0x70] sm:$0xff] }
0x1093   :  { %v4220_v17 = vld [vmem:[%s5633_s13 + $0x78] sm:$0xff] }
0x10bf   :  { %v2805_v18 = vpop.permute.xlu0 %2804 }
0x10c0   :  { %v2815_v20 = vsel %vm315_vm4, %v2301_v61, %v2805_v18  ;;  %v4735_v61 = vpack.c.bf16 %v4216_v60, %v4215_v56  ;;  %v4743_v18 = vpack.c.bf16 %v4220_v17, %v4219_v16 }
0x10f0   :  { %v2809_v19 = vpop.permute.xlu1 %2808 }
0x10f1   :  { %v2816_v21 = vsel %vm989_vm5, %v2815_v20, %v2809_v19  ;;  %v4210_v19 = vld [vmem:[%s5636_s12 + $0x1] ss:$0 sm:$0xff] }
0x10f4   :  { %v2813_v22 = vpop.permute.xlu1 %2812 }
0x10f5   :  { %v2817_v23 = vsel %vm991_vm6, %v2816_v21, %v2813_v22 }
0x10f6   :  { %4612 = vmatprep.mubr.msk.f32.mxu0 %vm176_vm2, %v2817_v23 }
0x10fc   :  { %v3483_v24 = vpop.permute.xlu0 %3482 }
0x10fd   :  { %v3493_v52 = vsel %vm315_vm4, %v2979_v11, %v3483_v24 }
0x1100   :  { %v3487_v25 = vpop.permute.xlu0 %3486 }
0x1101   :  { %v3494_v26 = vsel %vm989_vm5, %v3493_v52, %v3487_v25  ;;  %v4222_v52 = vld [vmem:[%s5637_s14 + $0x1] ss:$0 sm:$0xff] }
0x1104   :  { %v3491_v27 = vpop.permute.xlu1 %3490 }
0x1105   :  { %v3495_v28 = vsel %vm991_vm6, %v3494_v26, %v3491_v27 }
0x1106   :  { %4613 = vmatmul.mubr.msk.f32.vlgmr.msra.gmra.mrb[36].mxu0 %vm176_vm2, %v3495_v28 }
0x1107   :  { %4734 = vmatpush3.bf16.msra.mxu0 %v4731_v57 }
0x1108   :  { %4736 = vmatprep.subr.bf16.mxu0 %v4735_v61 }
0x110b   :  { %4738 = vmatpush3.bf16.msra.mxu0 %v4735_v61 }
0x110c   :  { %4740 = vmatprep.subr.bf16.mxu0 %v4739_v2 }
0x110f   :  { %4742 = vmatpush3.bf16.msra.mxu0 %v4739_v2 }
0x1110   :  { %4744 = vmatprep.subr.bf16.mxu0 %v4743_v18 }
0x1113   :  { %4746 = vmatpush3.bf16.msra.mxu0 %v4743_v18 }
0x11d9   :  { %v4614_v30 = vpop.f32.mrb[36].mxu0 }
0x11da   :  { %v3587_v31 = vadd.f32 %v4614_v30, %v4198_v29  ;;  %v3581_v32 = vpop.f32.mrb[37].mxu0 }
0x11db   :  { %v3582_v33 = vadd.f32 %v4198_v29, %v3581_v32 }
0x11dc   :  { %v3591_v34 = vadd.f32 %v3587_v31, %v5319_v59 }
0x11dd   :  { %v3590_v35 = vadd.f32 %v3582_v33, %v5317_v58  ;;  %v4205_v58 = vld [vmem:[%s5632_s11 + $0x20] sm:$0xff] }
0x11de   :  { %v3599_v0 = vsel %vm176_vm2, %v3591_v34, 0.0  ;;  %v4723_v48 = vpack.c.bf16 %v4206_v45, %v4205_v58 }
0x11df   :  { %3600 = vadd.xlane.f32.xlu1 %v3599_v0  ;;  %v3596_v36 = vsel %vm176_vm2, %v3590_v35, 0.0 }
0x11e0   :  { %3597 = vadd.xlane.f32.xlu0 %v3596_v36  ;;  %4724 = vmatprep.subr.bf16.mxu1 %v4723_v48 }
0x11e1   :  { %4726 = vmatpush3.bf16.msra.mxu1 %v4723_v48 }
0x11e2   :  { %4728 = vmatprep.subr.bf16.mxu1 %v4727_v53 }
0x11e5   :  { %4730 = vmatpush3.bf16.msra.mxu1 %v4727_v53 }
0x126c   :  { %v3601_v46 = vpop.xlane.xlu1 %3600 }
0x126d   :  { %v3603_v44 = vmul.f32 0.03125, %v3601_v46  ;;  %v3598_v37 = vpop.xlane.xlu0 %3597 }
0x126e   :  { %v3602_v38 = vmul.f32 0.03125, %v3598_v37 }
0x126f   :  { %v3605_v39 = vsub.f32 %v3591_v34, %v3603_v44 }
0x1270   :  { %v3604_v40 = vsub.f32 %v3590_v35, %v3602_v38 }
0x1271   :  { %v3607_v43 = vmul.f32 %v3605_v39, %v3605_v39 }
0x1272   :  { %v3606_v41 = vmul.f32 %v3604_v40, %v3604_v40 }
0x1273   :  { %v3611_v59 = vsel %vm176_vm2, %v3607_v43, 0.0 }
0x1274   :  { %v3608_v42 = vsel %vm176_vm2, %v3606_v41, 0.0 }
0x1275   :  { %3609 = vadd.xlane.f32.xlu0 %v3608_v42 }
0x1279   :  { %3612 = vadd.xlane.f32.xlu0 %v3611_v59 }
0x1302   :  { %v3610_v3 = vpop.xlane.xlu0 %3609 }
0x1303   :  { %v3614_v4 = vmul.f32 0.03125, %v3610_v3 }
0x1305   :  { %v3616_v51 = vadd.f32 1e-05, %v3614_v4 }
0x1306   :  { %v3613_v47 = vpop.xlane.xlu0 %3612 }
0x1307   :  { %4851 = vrsqrt.f32 %v3616_v51  ;;  %v3615_v5 = vmul.f32 0.03125, %v3613_v47 }
0x1309   :  { %v3617_v6 = vadd.f32 1e-05, %v3615_v5 }
0x130b   :  { %4853 = vrsqrt.f32 %v3617_v6 }
0x1311   :  { %v4852_v7 = vpop.eup %4851 }
0x1312   :  { %v3620_v9 = vmul.f32 %v4852_v7, %v3604_v40 }
0x1314   :  { %v3628_v11 = vmul.f32 %v4203_v8, %v3620_v9 }
0x1315   :  { %v4854_v12 = vpop.eup %4853 }
0x1316   :  { %v3621_v13 = vmul.f32 %v4854_v12, %v3605_v39  ;;  %v3636_v14 = vadd.f32 %v4204_v10, %v3628_v11  ;;  %v3925_v11 = vld [vmem:[%s5640_s19 + $0x8] sm:$0xff] }
0x1318   :  { %v3629_v15 = vmul.f32 %v4203_v8, %v3621_v13  ;;  %4623 = vmatprep.mubr.msk.f32.mxu1 %vm176_vm2, %v3636_v14  ;;  %v3926_v13 = vld [vmem:[%s5640_s19 + $0x10] sm:$0xff] }
0x131a   :  { %v3637_v63 = vadd.f32 %v4204_v10, %v3629_v15  ;;  %v3924_v10 = vld [vmem:[%s5640_s19] sm:$0xff] }
0x131b   :  { %v4747_v12 = vpack.c.bf16 %v3925_v11, %v3924_v10 }
0x131c   :  { %4624 = vmatmul.mubr.msk.f32.vlgmr.msra.gmra.mrb[40].mxu1 %vm176_vm2, %v3637_v63 }
0x131d   :  { %4748 = vmatprep.subr.bf16.mxu1 %v4747_v12 }
0x131e   :  { %4750 = vmatpush3.bf16.msra.mxu1 %v4747_v12 }
0x13ef   :  { %v4625_v20 = vpop.f32.mrb[40].mxu1 }
0x13f0   :  { %v3729_v21 = vadd.f32 %v4625_v20, %v4210_v19  ;;  %v3723_v22 = vpop.f32.mrb[41].mxu1 }
0x13f1   :  { %v3724_v23 = vadd.f32 %v4210_v19, %v3723_v22  ;;  %v4229_v22 = vld [vmem:[%s5641_s17] ss:$0 sm:$0xff] }
0x13f2   :  { %v3733_v25 = vmax.f32 %v3729_v21, 0.0 }
0x13f3   :  { %v3732_v24 = vmax.f32 %v3724_v23, 0.0 }
0x13f5   :  { %4642 = vmatprep.mubr.msk.f32.mxu0 %vm1918_vm7, %v3732_v24 }
0x13f6   :  { %4643 = vmatmul.mubr.msk.f32.vlgmr.msra.gmra.mrb[38].mxu0 %vm1918_vm7, %v3733_v25 }
0x14c9   :  { %v4644_v26 = vpop.f32.mrb[38].mxu0 }
0x14ca   :  { %v3829_v27 = vadd.f32 %v4644_v26, %v4222_v52  ;;  %v3823_v28 = vpop.f32.mrb[39].mxu0 }
0x14cb   :  { %v3824_v29 = vadd.f32 %v4222_v52, %v3823_v28  ;;  %v4230_v52 = vld [vmem:[%s5642_s18] ss:$0 sm:$0xff] }
0x14cc   :  { %v3833_v30 = vadd.f32 %v3829_v27, %v3637_v63 }
0x14cd   :  { %v3832_v31 = vadd.f32 %v3824_v29, %v3636_v14  ;;  %v3927_v14 = vld [vmem:[%s5640_s19 + $0x18] sm:$0xff] }
0x14ce   :  { %v3841_v32 = vsel %vm176_vm2, %v3833_v30, 0.0  ;;  %v4751_v15 = vpack.c.bf16 %v3927_v14, %v3926_v13 }
0x14cf   :  { %3842 = vadd.xlane.f32.xlu1 %v3841_v32  ;;  %v3838_v33 = vsel %vm176_vm2, %v3832_v31, 0.0 }
0x14d0   :  { %3839 = vadd.xlane.f32.xlu0 %v3838_v33  ;;  %4752 = vmatprep.subr.bf16.mxu1 %v4751_v15  ;;  %v4231_v33 = vld [vmem:[%s5644_s20] ss:$0 sm:$0xff] }
0x14d1   :  { %4754 = vmatpush3.bf16.msra.mxu1 %v4751_v15 }
0x155c   :  { %v3843_v34 = vpop.xlane.xlu1 %3842 }
0x155d   :  { %v3845_v35 = vmul.f32 0.03125, %v3843_v34  ;;  %v3840_v0 = vpop.xlane.xlu0 %3839 }
0x155e   :  { %v3844_v36 = vmul.f32 0.03125, %v3840_v0 }
0x155f   :  { %v3847_v46 = vsub.f32 %v3833_v30, %v3845_v35  ;;  %v4018_v30 = vld [vmem:[%s5643_s21] sm:$0xff] }
0x1560   :  { %v3846_v44 = vsub.f32 %v3832_v31, %v3844_v36  ;;  %v4019_v31 = vld [vmem:[%s5643_s21 + $0x8] sm:$0xff] }
0x1561   :  { %v3849_v37 = vmul.f32 %v3847_v46, %v3847_v46  ;;  %v4755_v32 = vpack.c.bf16 %v4019_v31, %v4018_v30 }
0x1562   :  { %v3848_v38 = vmul.f32 %v3846_v44, %v3846_v44 }
0x1563   :  { %v3853_v39 = vsel %vm176_vm2, %v3849_v37, 0.0  ;;  %4756 = vmatprep.subr.bf16.mxu1 %v4755_v32  ;;  %v4234_v37 = vld [vmem:[%s5645_s22] ss:$0 sm:$0xff] }
0x1564   :  { %3854 = vadd.xlane.f32.xlu1 %v3853_v39  ;;  %v3850_v40 = vsel %vm176_vm2, %v3848_v38, 0.0 }
0x1565   :  { %3851 = vadd.xlane.f32.xlu0 %v3850_v40 }
0x15f1   :  { %v3855_v41 = vpop.xlane.xlu1 %3854 }
0x15f2   :  { %v3857_v42 = vmul.f32 0.03125, %v3855_v41  ;;  %v3852_v43 = vpop.xlane.xlu0 %3851 }
0x15f3   :  { %v3856_v59 = vmul.f32 0.03125, %v3852_v43 }
0x15f4   :  { %v3859_v58 = vadd.f32 1e-05, %v3857_v42 }
0x15f5   :  { %v3858_v45 = vadd.f32 1e-05, %v3856_v59 }
0x15f6   :  { %4855 = vrsqrt.f32 %v3859_v58 }
0x15f7   :  { %4857 = vrsqrt.f32 %v3858_v45 }
0x1600   :  { %v4856_v48 = vpop.eup %4855 }
0x1601   :  { %v4858_v50 = vpop.eup %4857  ;;  %v3863_v53 = vmul.f32 %v4856_v48, %v3847_v46 }
0x1602   :  { %v3862_v55 = vmul.f32 %v4858_v50, %v3846_v44 }
0x1603   :  { %v3871_v56 = vmul.f32 %v4227_v49, %v3863_v53 }
0x1604   :  { %v3870_v57 = vmul.f32 %v4227_v49, %v3862_v55 }
0x1605   :  { %v3879_v60 = vadd.f32 %v4228_v54, %v3871_v56 }
0x1606   :  { %v3878_v61 = vadd.f32 %v4228_v54, %v3870_v57 }
0x1607   :  { %v3885_v62 = vsel %vm176_vm2, %v3879_v60, 0.0 }
0x1608   :  { %3886 = vadd.xlane.f32.xlu1 %v3885_v62  ;;  %v3882_v1 = vsel %vm176_vm2, %v3878_v61, 0.0 }
0x1609   :  { %3883 = vadd.xlane.f32.xlu0 %v3882_v1 }
0x1695   :  { %v3887_v2 = vpop.xlane.xlu1 %3886 }
0x1696   :  { %v3889_v3 = vmul.f32 0.03125, %v3887_v2  ;;  %v3884_v4 = vpop.xlane.xlu0 %3883 }
0x1697   :  { %v3888_v51 = vmul.f32 0.03125, %v3884_v4 }
0x1698   :  { %v3891_v47 = vsub.f32 %v3879_v60, %v3889_v3 }
0x1699   :  { %v3890_v5 = vsub.f32 %v3878_v61, %v3888_v51 }
0x169a   :  { %v3893_v6 = vmul.f32 %v3891_v47, %v3891_v47 }
0x169b   :  { %v3892_v7 = vmul.f32 %v3890_v5, %v3890_v5 }
0x169c   :  { %v3897_v8 = vsel %vm176_vm2, %v3893_v6, 0.0 }
0x169d   :  { %3898 = vadd.xlane.f32.xlu1 %v3897_v8  ;;  %v3894_v9 = vsel %vm176_vm2, %v3892_v7, 0.0 }
0x169e   :  { %3895 = vadd.xlane.f32.xlu0 %v3894_v9 }
0x172a   :  { %v3899_v63 = vpop.xlane.xlu1 %3898 }
0x172b   :  { %v3901_v16 = vmul.f32 0.03125, %v3899_v63  ;;  %v3896_v17 = vpop.xlane.xlu0 %3895 }
0x172c   :  { %v3900_v18 = vmul.f32 0.03125, %v3896_v17 }
0x172d   :  { %v3903_v19 = vadd.f32 1e-05, %v3901_v16 }
0x172e   :  { %v3902_v20 = vadd.f32 1e-05, %v3900_v18 }
0x172f   :  { %4859 = vrsqrt.f32 %v3903_v19 }
0x1730   :  { %4861 = vrsqrt.f32 %v3902_v20 }
0x1739   :  { %v4860_v21 = vpop.eup %4859 }
0x173a   :  { %v4862_v23 = vpop.eup %4861  ;;  %v3907_v24 = vmul.f32 %v4860_v21, %v3891_v47 }
0x173b   :  { %v3906_v25 = vmul.f32 %v4862_v23, %v3890_v5 }
0x173c   :  { %v3915_v26 = vmul.f32 %v4229_v22, %v3907_v24 }
0x173d   :  { %v3914_v27 = vmul.f32 %v4229_v22, %v3906_v25 }
0x173e   :  { %v3923_v29 = vadd.f32 %v4230_v52, %v3915_v26 }
0x173f   :  { %v3922_v28 = vadd.f32 %v4230_v52, %v3914_v27 }
0x1741   :  { %4653 = vmatprep.mubr.msk.f32.mxu1 %vm176_vm2, %v3922_v28 }
0x1742   :  { %4654 = vmatmul.mubr.msk.f32.vlgmr.msra.gmra.mrb[42].mxu1 %vm176_vm2, %v3923_v29 }
0x1743   :  { %4758 = vmatpush3.bf16.msra.mxu1 %v4755_v32 }
0x1815   :  { %v4655_v34 = vpop.f32.mrb[42].mxu1 }
0x1816   :  { %v4013_v35 = vadd.f32 %v4655_v34, %v4231_v33  ;;  %v4007_v0 = vpop.f32.mrb[43].mxu1 }
0x1817   :  { %v4008_v36 = vadd.f32 %v4231_v33, %v4007_v0 }
0x1818   :  { %v4017_v44 = vmax.f32 %v4013_v35, 0.0 }
0x1819   :  { %v4016_v46 = vmax.f32 %v4008_v36, 0.0 }
0x181b   :  { %4660 = vmatprep.mubr.msk.f32.mxu1 %vm989_vm5, %v4016_v46 }
0x181c   :  { %4661 = vmatmul.mubr.msk.f32.vlgmr.msra.gmra.mrb[44].mxu1 %vm989_vm5, %v4017_v44 }
0x18ef   :  { %v4662_v38 = vpop.f32.mrb[44].mxu1 }
0x18f0   :  { %v4105_v39 = vadd.f32 %v4662_v38, %v4234_v37  ;;  %v4099_v40 = vpop.f32.mrb[45].mxu1 }
0x18f1   :  { %v4100_v41 = vadd.f32 %v4234_v37, %v4099_v40 }
0x18f2   :  { %4110 = vst.msk [vmem:[%s5646_s23 + $0x8] sm:$0xff] %vm4108_vm8, %v4105_v39 }
0x18f3   :  { %4109 = vst.msk [vmem:[%s5646_s23] sm:$0xff] %vm4108_vm8, %v4100_v41 }

</bundles_post_ra>
